<compile_context>
chip_gen: v5e
topology: v5e:2x2
jax: 0.10.0
libtpu: 0.0.40
codegen_flags: <defaults>
</compile_context>

<pallas_src>
import functools

import jax
import jax.numpy as jnp
from jax import lax
from jax.experimental import pallas as pl
from jax.experimental.pallas import tpu as pltpu


def _dwsep_kernel(x_ref, wdw_ref, bdw_ref, wpw_ref, bpw_ref, out_ref):
    """One grid step: `block_n` whole (H+1-padded) images.

    x_ref  : [bn, H+2, W+2, Cin]  zero-padded input block (NHWC)
    wdw_ref: [3, 3, Cin]          depthwise taps (dw-BN scale folded in), f32
    bdw_ref: [1, Cin]             folded dw-BN bias, f32
    wpw_ref: [Cin, Cout]          pointwise weights (pw-BN scale folded in)
    bpw_ref: [1, Cout]            folded pw-BN bias, f32
    out_ref: [bn, H, W, Cout]
    """
    bn, Hp, Wp, Cin = x_ref.shape
    H, W = Hp - 2, Wp - 2
    Cout = out_ref.shape[-1]

    wdw = wdw_ref[...]  # [3, 3, Cin] f32

    # Depthwise 3x3, stride=1: three width-shifted slabs over the full padded
    # height (the only sublane-misaligned reads), reused for the three row
    # taps via cheap H slices.  Accumulator seeded with the first tap.
    acc = None
    for kw in range(3):
        slab = x_ref[:, :, kw:kw + W, :].astype(jnp.float32)  # [bn, Hp, W, Cin]
        for kh in range(3):
            term = slab[:, kh:kh + H, :, :] * wdw[kh, kw]      # per-channel tap
            acc = term if acc is None else acc + term

    # Folded dw-BN bias + ReLU (scale already folded into wdw).
    y = jnp.maximum(acc + bdw_ref[...], 0.0)                   # [bn, H, W, Cin]

    # Pointwise 1x1 conv == (bn*H*W, Cin) @ (Cin, Cout) on the MXU with f32
    # accumulation, then the folded pw-BN bias.  (No ReLU afterwards, per the
    # module.)  Operands are cast to the weight dtype (bf16 by default).
    # NOTE: the flatten/unflatten is layout-free when W is a multiple of 8.
    y2 = y.reshape(bn * H * W, Cin).astype(wpw_ref.dtype)
    z = jnp.dot(y2, wpw_ref[...], preferred_element_type=jnp.float32)
    z = z + bpw_ref[...]
    out_ref[...] = z.reshape(bn, H, W, Cout).astype(out_ref.dtype)


def _fold_bn(gamma, beta, mean, var, eps=1e-5):
    gamma = gamma.astype(jnp.float32)
    beta = beta.astype(jnp.float32)
    mean = mean.astype(jnp.float32)
    var = var.astype(jnp.float32)
    scale = gamma / jnp.sqrt(var + eps)
    bias = beta - mean * scale
    return scale, bias


def _estimate_vmem_bytes(block_n, H, W, Cin, Cout, x_bytes, out_bytes,
                         mm_bytes):
    """Approximate per-step VMEM: double-buffered in/out/weight blocks plus
    the f32 intermediates that live inside the kernel."""
    Hp, Wp = H + 2, W + 2
    in_blk = block_n * Hp * Wp * Cin * x_bytes
    out_blk = block_n * H * W * Cout * out_bytes
    w_blk = (9 * Cin + Cin) * 4 + Cin * Cout * mm_bytes + Cout * 4
    slab = block_n * Hp * W * Cin * 4          # one live f32 kw-slab
    acc = block_n * H * W * Cin * 4            # depthwise accumulator / relu
    mm_lhs = block_n * H * W * Cin * mm_bytes  # matmul lhs operand
    mm_out = block_n * H * W * Cout * 4        # f32 matmul result
    return 2 * (in_blk + out_blk + w_blk) + slab + acc + mm_lhs + mm_out


def _pick_block_n(N, H, W, Cin, Cout, x_bytes, out_bytes, mm_bytes,
                  budget_bytes):
    """Images per grid step: fit the VMEM budget, keep >= 2 grid steps when
    the batch allows (v7x megacore), and fold enough images to reach an
    MXU-friendly matmul M (= block_n*H*W)."""
    divisors = [d for d in range(1, N + 1) if N % d == 0]
    fits = [d for d in divisors
            if _estimate_vmem_bytes(d, H, W, Cin, Cout, x_bytes, out_bytes,
                                    mm_bytes) <= budget_bytes]
    if not fits:
        # TODO(synk): row tiling for activations too large for VMEM.
        raise NotImplementedError(
            "a single image exceeds the VMEM budget; row tiling not implemented")
    pref = [d for d in fits if N // d >= 2] or fits
    for d in pref:                       # ascending: smallest that fills MXU
        if d * H * W >= 256:
            return d
    return pref[-1]                      # largest that fits otherwise


def depthwise_separable_conv(x_nchw, w_dw, w_pw, bn_dw, bn_pw, *, eps=1e-5,
                             stride=1, block_n=None,
                             matmul_dtype=jnp.bfloat16,
                             vmem_budget_bytes=24 * 1024 * 1024,
                             vmem_limit_bytes=48 * 1024 * 1024):
    """Fused DepthwiseSeparableConv forward (inference-mode BN).

    x_nchw: [N, Cin, H, W]; w_dw: [Cin, 1, 3, 3]; w_pw: [Cout, Cin, 1, 1]
    bn_dw / bn_pw: (gamma, beta, running_mean, running_var)
    Returns [N, Cout, H, W].
    """
    if stride != 1:
        # TODO(synk): stride=2 depthwise path used by ResNet downsampling blocks.
        raise NotImplementedError("only the stride=1 path is implemented")

    N, Cin, H, W = x_nchw.shape
    Cout = w_pw.shape[0]
    out_dtype = x_nchw.dtype

    scale_dw, bias_dw = _fold_bn(*bn_dw, eps=eps)
    scale_pw, bias_pw = _fold_bn(*bn_pw, eps=eps)

    # Fold BN scales into the conv weights (kernel then only adds the bias).
    wdw = jnp.transpose(w_dw[:, 0, :, :], (1, 2, 0)).astype(jnp.float32)
    wdw = wdw * scale_dw[None, None, :]                       # [3, 3, Cin] f32
    wpw = jnp.transpose(w_pw[:, :, 0, 0], (1, 0)).astype(jnp.float32)
    wpw = (wpw * scale_pw[None, :]).astype(matmul_dtype)      # [Cin, Cout]

    # NCHW -> NHWC plus H/W zero-padding: one layout pass (transpose+pad fuse
    # under jit).  In-kernel access then needs no halo handling or masking.
    x = jnp.transpose(x_nchw, (0, 2, 3, 1))
    xp = jnp.pad(x, ((0, 0), (1, 1), (1, 1), (0, 0)))          # [N, H+2, W+2, Cin]

    mm_bytes = jnp.dtype(matmul_dtype).itemsize
    if block_n is None:
        block_n = _pick_block_n(N, H, W, Cin, Cout, xp.dtype.itemsize,
                                jnp.dtype(out_dtype).itemsize, mm_bytes,
                                vmem_budget_bytes)
    if N % block_n != 0:
        raise ValueError(f"block_n={block_n} must divide N={N}")
    nsteps = N // block_n

    grid_spec = pltpu.PrefetchScalarGridSpec(
        num_scalar_prefetch=0,
        grid=(nsteps,),
        in_specs=[
            pl.BlockSpec((block_n, H + 2, W + 2, Cin), lambda n: (n, 0, 0, 0)),
            pl.BlockSpec((3, 3, Cin), lambda n: (0, 0, 0)),
            pl.BlockSpec((1, Cin), lambda n: (0, 0)),
            pl.BlockSpec((Cin, Cout), lambda n: (0, 0)),
            pl.BlockSpec((1, Cout), lambda n: (0, 0)),
        ],
        out_specs=pl.BlockSpec((block_n, H, W, Cout), lambda n: (n, 0, 0, 0)),
    )

    out_nhwc = pl.pallas_call(
        _dwsep_kernel,
        out_shape=jax.ShapeDtypeStruct((N, H, W, Cout), out_dtype),
        grid_spec=grid_spec,
        compiler_params=pltpu.CompilerParams(
            dimension_semantics=("parallel",),
            vmem_limit_bytes=vmem_limit_bytes),
    )(xp, wdw, bias_dw.reshape(1, Cin), wpw, bias_pw.reshape(1, Cout))

    # NHWC -> NCHW to match the PyTorch layout contract.
    return jnp.transpose(out_nhwc, (0, 3, 1, 2))


def _reference(x_nchw, w_dw, w_pw, bn_dw, bn_pw, eps=1e-5):
    """Pure-JAX reference matching PyTorch eval-mode semantics."""
    Cin = x_nchw.shape[1]
    prec = jax.lax.Precision.HIGHEST
    y = lax.conv_general_dilated(
        x_nchw.astype(jnp.float32), w_dw.astype(jnp.float32),
        window_strides=(1, 1), padding=((1, 1), (1, 1)),
        feature_group_count=Cin, precision=prec,
        dimension_numbers=("NCHW", "OIHW", "NCHW"))
    s, b = _fold_bn(*bn_dw, eps=eps)
    y = y * s[None, :, None, None] + b[None, :, None, None]
    y = jnp.maximum(y, 0.0)
    z = lax.conv_general_dilated(
        y, w_pw.astype(jnp.float32),
        window_strides=(1, 1), padding="VALID", precision=prec,
        dimension_numbers=("NCHW", "OIHW", "NCHW"))
    s, b = _fold_bn(*bn_pw, eps=eps)
    return z * s[None, :, None, None] + b[None, :, None, None]


if __name__ == "__main__":
    N, Cin, Cout, H, W = 2, 4, 8, 16, 16
    key = jax.random.PRNGKey(0)
    k = jax.random.split(key, 10)

    x = jax.random.normal(k[0], (N, Cin, H, W), jnp.float32)

    # Conv weights (deterministic synthetic init).
    w_dw = 0.2 * jax.random.normal(k[1], (Cin, 1, 3, 3), jnp.float32)
    w_pw = 0.2 * jax.random.normal(k[2], (Cout, Cin, 1, 1), jnp.float32)

    # BatchNorm params / running stats (eval mode).
    bn_dw = (1.0 + 0.1 * jax.random.normal(k[3], (Cin,), jnp.float32),   # gamma
             0.1 * jax.random.normal(k[4], (Cin,), jnp.float32),         # beta
             0.1 * jax.random.normal(k[5], (Cin,), jnp.float32),         # mean
             1.0 + 0.1 * jax.random.uniform(k[6], (Cin,), jnp.float32))  # var
    bn_pw = (1.0 + 0.1 * jax.random.normal(k[7], (Cout,), jnp.float32),
             0.1 * jax.random.normal(k[8], (Cout,), jnp.float32),
             0.1 * jax.random.normal(k[9], (Cout,), jnp.float32),
             jnp.full((Cout,), 1.2, jnp.float32))

    ref = _reference(x, w_dw, w_pw, bn_dw, bn_pw)

    # 1) f32 matmul operands, one image per step (grid=(2,)).
    #    Tolerance allows for MXU operand rounding on TPU.
    run_f32 = jax.jit(functools.partial(depthwise_separable_conv,
                                        matmul_dtype=jnp.float32))
    out = jax.block_until_ready(run_f32(x, w_dw, w_pw, bn_dw, bn_pw))
    assert out.shape == (N, Cout, H, W)
    err = float(jnp.max(jnp.abs(out - ref)))
    assert err < 2e-2, f"f32-path max err {err}"

    # 2) Default bf16 matmul operands (the recommended perf path on v5e/v6e/v7x).
    run_bf16 = jax.jit(depthwise_separable_conv)
    out2 = jax.block_until_ready(run_bf16(x, w_dw, w_pw, bn_dw, bn_pw))
    err2 = float(jnp.max(jnp.abs(out2 - ref)))
    assert err2 < 7e-2, f"bf16-path max err {err2}"

    # 3) Both images folded into one grid step (block_n=2): exercises the
    #    batch-folded matmul path used for small spatial stages.
    run_blk = jax.jit(functools.partial(depthwise_separable_conv, block_n=2,
                                        matmul_dtype=jnp.float32))
    out3 = jax.block_until_ready(run_blk(x, w_dw, w_pw, bn_dw, bn_pw))
    err3 = float(jnp.max(jnp.abs(out3 - ref)))
    assert err3 < 2e-2, f"block_n=2 path max err {err3}"

    print("KERNEL_OK")
</pallas_src>

<mosaic_0001>
module attributes {stable_mosaic.version = 11 : i64} {
  func.func @_dwsep_kernel(%arg0: i32, %arg1: memref<1x18x18x4xf32, #tpu.memory_space<vmem>>, %arg2: memref<3x3x4xf32, #tpu.memory_space<vmem>>, %arg3: memref<1x4xf32, #tpu.memory_space<vmem>>, %arg4: memref<4x8xf32, #tpu.memory_space<vmem>>, %arg5: memref<1x8xf32, #tpu.memory_space<vmem>>, %arg6: memref<1x16x16x8xf32, #tpu.memory_space<vmem>>) attributes {dimension_semantics = [#tpu.dimension_semantics<parallel>], iteration_bounds = array<i64: 2>, scalar_prefetch = 0 : i64, scratch_operands = 0 : i64, tpu.core_type = #tpu.core_type<tc>, window_params = [{transform_indices = @transform_0, window_bounds = array<i64: 1, 18, 18, 4>}, {pipeline_mode = #tpu.pipeline_mode<synchronous>, transform_indices = @transform_1, window_bounds = array<i64: 3, 3, 4>}, {pipeline_mode = #tpu.pipeline_mode<synchronous>, transform_indices = @transform_2, window_bounds = array<i64: 1, 4>}, {pipeline_mode = #tpu.pipeline_mode<synchronous>, transform_indices = @transform_3, window_bounds = array<i64: 4, 8>}, {pipeline_mode = #tpu.pipeline_mode<synchronous>, transform_indices = @transform_4, window_bounds = array<i64: 1, 8>}, {transform_indices = @transform_5, window_bounds = array<i64: 1, 16, 16, 8>}]} {
    %c0 = arith.constant 0 : index
    %c0_0 = arith.constant 0 : index
    %c0_1 = arith.constant 0 : index
    %0 = vector.load %arg2[%c0, %c0_0, %c0_1] : memref<3x3x4xf32, #tpu.memory_space<vmem>>, vector<3x3x4xf32>
    %c0_2 = arith.constant 0 : index
    %c0_3 = arith.constant 0 : index
    %c0_4 = arith.constant 0 : index
    %c0_5 = arith.constant 0 : index
    %1 = vector.load %arg1[%c0_2, %c0_3, %c0_4, %c0_5] : memref<1x18x18x4xf32, #tpu.memory_space<vmem>>, vector<1x18x16x4xf32>
    %2 = vector.extract_strided_slice %1 {offsets = [0, 0, 0, 0], sizes = [1, 16, 16, 4], strides = [1, 1, 1, 1]} : vector<1x18x16x4xf32> to vector<1x16x16x4xf32>
    %3 = vector.extract_strided_slice %0 {offsets = [0, 0, 0], sizes = [1, 1, 4], strides = [1, 1, 1]} : vector<3x3x4xf32> to vector<1x1x4xf32>
    %4 = vector.shape_cast %3 : vector<1x1x4xf32> to vector<4xf32>
    %5 = vector.shape_cast %4 : vector<4xf32> to vector<1x1x1x4xf32>
    %6 = vector.broadcast %5 : vector<1x1x1x4xf32> to vector<1x16x16x4xf32>
    %7 = arith.mulf %2, %6 : vector<1x16x16x4xf32>
    %8 = vector.extract_strided_slice %1 {offsets = [0, 1, 0, 0], sizes = [1, 16, 16, 4], strides = [1, 1, 1, 1]} : vector<1x18x16x4xf32> to vector<1x16x16x4xf32>
    %9 = vector.extract_strided_slice %0 {offsets = [1, 0, 0], sizes = [1, 1, 4], strides = [1, 1, 1]} : vector<3x3x4xf32> to vector<1x1x4xf32>
    %10 = vector.shape_cast %9 : vector<1x1x4xf32> to vector<4xf32>
    %11 = vector.shape_cast %10 : vector<4xf32> to vector<1x1x1x4xf32>
    %12 = vector.broadcast %11 : vector<1x1x1x4xf32> to vector<1x16x16x4xf32>
    %13 = arith.mulf %8, %12 : vector<1x16x16x4xf32>
    %14 = arith.addf %7, %13 : vector<1x16x16x4xf32>
    %15 = vector.extract_strided_slice %1 {offsets = [0, 2, 0, 0], sizes = [1, 16, 16, 4], strides = [1, 1, 1, 1]} : vector<1x18x16x4xf32> to vector<1x16x16x4xf32>
    %16 = vector.extract_strided_slice %0 {offsets = [2, 0, 0], sizes = [1, 1, 4], strides = [1, 1, 1]} : vector<3x3x4xf32> to vector<1x1x4xf32>
    %17 = vector.shape_cast %16 : vector<1x1x4xf32> to vector<4xf32>
    %18 = vector.shape_cast %17 : vector<4xf32> to vector<1x1x1x4xf32>
    %19 = vector.broadcast %18 : vector<1x1x1x4xf32> to vector<1x16x16x4xf32>
    %20 = arith.mulf %15, %19 : vector<1x16x16x4xf32>
    %21 = arith.addf %14, %20 : vector<1x16x16x4xf32>
    %c0_6 = arith.constant 0 : index
    %c0_7 = arith.constant 0 : index
    %c1 = arith.constant 1 : index
    %c0_8 = arith.constant 0 : index
    %22 = vector.load %arg1[%c0_6, %c0_7, %c1, %c0_8] : memref<1x18x18x4xf32, #tpu.memory_space<vmem>>, vector<1x18x16x4xf32>
    %23 = vector.extract_strided_slice %22 {offsets = [0, 0, 0, 0], sizes = [1, 16, 16, 4], strides = [1, 1, 1, 1]} : vector<1x18x16x4xf32> to vector<1x16x16x4xf32>
    %24 = vector.extract_strided_slice %0 {offsets = [0, 1, 0], sizes = [1, 1, 4], strides = [1, 1, 1]} : vector<3x3x4xf32> to vector<1x1x4xf32>
    %25 = vector.shape_cast %24 : vector<1x1x4xf32> to vector<4xf32>
    %26 = vector.shape_cast %25 : vector<4xf32> to vector<1x1x1x4xf32>
    %27 = vector.broadcast %26 : vector<1x1x1x4xf32> to vector<1x16x16x4xf32>
    %28 = arith.mulf %23, %27 : vector<1x16x16x4xf32>
    %29 = arith.addf %21, %28 : vector<1x16x16x4xf32>
    %30 = vector.extract_strided_slice %22 {offsets = [0, 1, 0, 0], sizes = [1, 16, 16, 4], strides = [1, 1, 1, 1]} : vector<1x18x16x4xf32> to vector<1x16x16x4xf32>
    %31 = vector.extract_strided_slice %0 {offsets = [1, 1, 0], sizes = [1, 1, 4], strides = [1, 1, 1]} : vector<3x3x4xf32> to vector<1x1x4xf32>
    %32 = vector.shape_cast %31 : vector<1x1x4xf32> to vector<4xf32>
    %33 = vector.shape_cast %32 : vector<4xf32> to vector<1x1x1x4xf32>
    %34 = vector.broadcast %33 : vector<1x1x1x4xf32> to vector<1x16x16x4xf32>
    %35 = arith.mulf %30, %34 : vector<1x16x16x4xf32>
    %36 = arith.addf %29, %35 : vector<1x16x16x4xf32>
    %37 = vector.extract_strided_slice %22 {offsets = [0, 2, 0, 0], sizes = [1, 16, 16, 4], strides = [1, 1, 1, 1]} : vector<1x18x16x4xf32> to vector<1x16x16x4xf32>
    %38 = vector.extract_strided_slice %0 {offsets = [2, 1, 0], sizes = [1, 1, 4], strides = [1, 1, 1]} : vector<3x3x4xf32> to vector<1x1x4xf32>
    %39 = vector.shape_cast %38 : vector<1x1x4xf32> to vector<4xf32>
    %40 = vector.shape_cast %39 : vector<4xf32> to vector<1x1x1x4xf32>
    %41 = vector.broadcast %40 : vector<1x1x1x4xf32> to vector<1x16x16x4xf32>
    %42 = arith.mulf %37, %41 : vector<1x16x16x4xf32>
    %43 = arith.addf %36, %42 : vector<1x16x16x4xf32>
    %c0_9 = arith.constant 0 : index
    %c0_10 = arith.constant 0 : index
    %c2 = arith.constant 2 : index
    %c0_11 = arith.constant 0 : index
    %44 = vector.load %arg1[%c0_9, %c0_10, %c2, %c0_11] : memref<1x18x18x4xf32, #tpu.memory_space<vmem>>, vector<1x18x16x4xf32>
    %45 = vector.extract_strided_slice %44 {offsets = [0, 0, 0, 0], sizes = [1, 16, 16, 4], strides = [1, 1, 1, 1]} : vector<1x18x16x4xf32> to vector<1x16x16x4xf32>
    %46 = vector.extract_strided_slice %0 {offsets = [0, 2, 0], sizes = [1, 1, 4], strides = [1, 1, 1]} : vector<3x3x4xf32> to vector<1x1x4xf32>
    %47 = vector.shape_cast %46 : vector<1x1x4xf32> to vector<4xf32>
    %48 = vector.shape_cast %47 : vector<4xf32> to vector<1x1x1x4xf32>
    %49 = vector.broadcast %48 : vector<1x1x1x4xf32> to vector<1x16x16x4xf32>
    %50 = arith.mulf %45, %49 : vector<1x16x16x4xf32>
    %51 = arith.addf %43, %50 : vector<1x16x16x4xf32>
    %52 = vector.extract_strided_slice %44 {offsets = [0, 1, 0, 0], sizes = [1, 16, 16, 4], strides = [1, 1, 1, 1]} : vector<1x18x16x4xf32> to vector<1x16x16x4xf32>
    %53 = vector.extract_strided_slice %0 {offsets = [1, 2, 0], sizes = [1, 1, 4], strides = [1, 1, 1]} : vector<3x3x4xf32> to vector<1x1x4xf32>
    %54 = vector.shape_cast %53 : vector<1x1x4xf32> to vector<4xf32>
    %55 = vector.shape_cast %54 : vector<4xf32> to vector<1x1x1x4xf32>
    %56 = vector.broadcast %55 : vector<1x1x1x4xf32> to vector<1x16x16x4xf32>
    %57 = arith.mulf %52, %56 : vector<1x16x16x4xf32>
    %58 = arith.addf %51, %57 : vector<1x16x16x4xf32>
    %59 = vector.extract_strided_slice %44 {offsets = [0, 2, 0, 0], sizes = [1, 16, 16, 4], strides = [1, 1, 1, 1]} : vector<1x18x16x4xf32> to vector<1x16x16x4xf32>
    %60 = vector.extract_strided_slice %0 {offsets = [2, 2, 0], sizes = [1, 1, 4], strides = [1, 1, 1]} : vector<3x3x4xf32> to vector<1x1x4xf32>
    %61 = vector.shape_cast %60 : vector<1x1x4xf32> to vector<4xf32>
    %62 = vector.shape_cast %61 : vector<4xf32> to vector<1x1x1x4xf32>
    %63 = vector.broadcast %62 : vector<1x1x1x4xf32> to vector<1x16x16x4xf32>
    %64 = arith.mulf %59, %63 : vector<1x16x16x4xf32>
    %65 = arith.addf %58, %64 : vector<1x16x16x4xf32>
    %c0_12 = arith.constant 0 : index
    %c0_13 = arith.constant 0 : index
    %66 = vector.load %arg3[%c0_12, %c0_13] : memref<1x4xf32, #tpu.memory_space<vmem>>, vector<1x4xf32>
    %67 = vector.shape_cast %66 : vector<1x4xf32> to vector<1x1x1x4xf32>
    %68 = vector.broadcast %67 : vector<1x1x1x4xf32> to vector<1x16x16x4xf32>
    %69 = arith.addf %65, %68 : vector<1x16x16x4xf32>
    %cst = arith.constant 0.000000e+00 : f32
    %70 = vector.broadcast %cst : f32 to vector<1x16x16x4xf32>
    %71 = arith.maximumf %69, %70 : vector<1x16x16x4xf32>
    %72 = vector.shape_cast %71 : vector<1x16x16x4xf32> to vector<256x4xf32>
    %c0_14 = arith.constant 0 : index
    %c0_15 = arith.constant 0 : index
    %73 = vector.load %arg4[%c0_14, %c0_15] : memref<4x8xf32, #tpu.memory_space<vmem>>, vector<4x8xf32>
    %cst_16 = arith.constant dense<0.000000e+00> : vector<256x8xf32>
    %74 = tpu.matmul %72, %73, %cst_16 {dimension_numbers = #tpu.dot_dimension_numbers<[1], [0], [0], [1], [0, 0, 1, 1], [], []>} : vector<256x4xf32>, vector<4x8xf32>, vector<256x8xf32> -> vector<256x8xf32>
    %c0_17 = arith.constant 0 : index
    %c0_18 = arith.constant 0 : index
    %75 = vector.load %arg5[%c0_17, %c0_18] : memref<1x8xf32, #tpu.memory_space<vmem>>, vector<1x8xf32>
    %76 = vector.broadcast %75 : vector<1x8xf32> to vector<256x8xf32>
    %77 = arith.addf %74, %76 : vector<256x8xf32>
    %78 = vector.shape_cast %77 : vector<256x8xf32> to vector<1x16x16x8xf32>
    %c0_19 = arith.constant 0 : index
    %c0_20 = arith.constant 0 : index
    %c0_21 = arith.constant 0 : index
    %c0_22 = arith.constant 0 : index
    %79 = vector.load %arg6[%c0_19, %c0_20, %c0_21, %c0_22] : memref<1x16x16x8xf32, #tpu.memory_space<vmem>>, vector<1x16x16x8xf32>
    tpu.vector_store %arg6[%c0_19, %c0_20, %c0_21, %c0_22], %78 {strides = array<i32>} : memref<1x16x16x8xf32, #tpu.memory_space<vmem>>, vector<1x16x16x8xf32>,
    return
  }
  func.func @transform_0(%arg0: i32) -> (i32, i32, i32, i32) {
    %c0_i32 = arith.constant 0 : i32
    %c0_i32_0 = arith.constant 0 : i32
    %c0_i32_1 = arith.constant 0 : i32
    %c0_i32_2 = arith.constant 0 : i32
    return %arg0, %c0_i32, %c0_i32_0, %c0_i32_1 : i32, i32, i32, i32
  }
  func.func @transform_1(%arg0: i32) -> (i32, i32, i32) {
    %c0_i32 = arith.constant 0 : i32
    %c0_i32_0 = arith.constant 0 : i32
    %c0_i32_1 = arith.constant 0 : i32
    %c0_i32_2 = arith.constant 0 : i32
    return %c0_i32, %c0_i32_0, %c0_i32_1 : i32, i32, i32
  }
  func.func @transform_2(%arg0: i32) -> (i32, i32) {
    %c0_i32 = arith.constant 0 : i32
    %c0_i32_0 = arith.constant 0 : i32
    %c0_i32_1 = arith.constant 0 : i32
    return %c0_i32, %c0_i32_0 : i32, i32
  }
  func.func @transform_3(%arg0: i32) -> (i32, i32) {
    %c0_i32 = arith.constant 0 : i32
    %c0_i32_0 = arith.constant 0 : i32
    %c0_i32_1 = arith.constant 0 : i32
    return %c0_i32, %c0_i32_0 : i32, i32
  }
  func.func @transform_4(%arg0: i32) -> (i32, i32) {
    %c0_i32 = arith.constant 0 : i32
    %c0_i32_0 = arith.constant 0 : i32
    %c0_i32_1 = arith.constant 0 : i32
    return %c0_i32, %c0_i32_0 : i32, i32
  }
  func.func @transform_5(%arg0: i32) -> (i32, i32, i32, i32) {
    %c0_i32 = arith.constant 0 : i32
    %c0_i32_0 = arith.constant 0 : i32
    %c0_i32_1 = arith.constant 0 : i32
    %c0_i32_2 = arith.constant 0 : i32
    return %arg0, %c0_i32, %c0_i32_0, %c0_i32_1 : i32, i32, i32, i32
  }
}

</mosaic_0001>

<bundles_post_ra>
// kernel: depthwise_separable_conv.1
= control target key start
LH: loop header
LB: loop body
LE: loop exit
PB: predicated region body
PF: predicated region fallthrough
CT: control target
= control target key end

     0   :  { %s1396_s18 = smov 0   ;;  %s2501_s0 = inlined_call_operand.vmem [shape: f32[2,18,18,4], index: 0, kind: input, shape index: {}]   ;;  %s2502_s1 = inlined_call_operand.vmem [shape: f32[3,3,4], index: 1, kind: input, shape index: {}]   ;;  %s2503_s2 = inlined_call_operand.vmem [shape: f32[1,4], index: 2, kind: input, shape index: {}]   ;;  %s2504_s3 = inlined_call_operand.vmem [shape: f32[4,8], index: 3, kind: input, shape index: {}]   ;;  %s2505_s4 = inlined_call_operand.vmem [shape: f32[1,8], index: 4, kind: input, shape index: {}]   ;;  %s2506_s5 = inlined_call_operand.vmem [shape: f32[2,16,16,8], index: 5, kind: output, shape index: {}]  }
   0x1 LB: > { %s1264_s19 = sadd.s32 4294967295, %s1364_s18   ;;  %p1268_p0 = scmp.ge.s32.totalorder %s1364_s18, 1  ;;  %s1364_s18 = sphi %s1396_s18, %s15_s18  }
   0x2   : > { %p187_p1 = scmp.lt.s32.totalorder %s1364_s18, 3 }
   0x4   : > { %p188_p2 = pnand %p1268_p0, %p187_p1 }
   0x6   : > { %191 = sbr.rel (%p188_p2) target bundleno = 312 (0x138), region = 40 }
   0xb   : > { %v957_v0 = vld [vmem:[%s2504_s3] sm:$0xf]  ;;  %vm1059_vm0 = vcmask 1043456   ;;  %p215_p3 = scmp.lt.s32.totalorder %s1264_s19, 1  ;;  %v226_v2 = vld [vmem:[%s2502_s1 + $0x4] sm:$0x7] }
   0xc   : > { %1309 = vmatpush.msk.msra.mxu2 %vm1059_vm0, %v957_v0  ;;  %1310 = vmatpush.msk.msra.mxu3 %vm1059_vm0, %v957_v0  ;;  %v225_v1 = vld [vmem:[%s2502_s1] sm:$0x7]  ;;  %v227_v3 = vld [vmem:[%s2502_s1 + $0x8] sm:$0x7]  ;;  %v1421_v5 = vperm.slane %v226_v2, 0  ;;  %v1432_v8 = vperm.slane %v226_v2, 1 }
   0xd   : > { %s2687_s19 = smov (!%p215_p3, %s1264_s19), 1  ;;  %1272 = vmatpush.msk.msra.mxu0 %vm1059_vm0, %v957_v0  ;;  %1308 = vmatpush.msk.msra.mxu1 %vm1059_vm0, %v957_v0  ;;  %v1419_v4 = vperm.slane %v225_v1, 0  ;;  %v1423_v6 = vperm.slane %v227_v3, 0  ;;  %v1430_v7 = vperm.slane %v225_v1, 1  ;;  %v1434_v9 = vperm.slane %v227_v3, 1 }
   0xe   : > { %s1311_s28 = smul.u32 432, %s2687_s19  ;;  %v1443_v13 = vperm.slane %v225_v1, 2  ;;  %v1445_v14 = vperm.slane %v226_v2, 2  ;;  %v1461_v21 = vperm.slane %v227_v3, 2  ;;  %vm962_vm1 = vcmask 31744   ;;  %s1307_s11 = sshll.u32 %s2687_s19, 8 }
   0xf   : > { %s2393_s16 = scalar_lea.vmem %s2506_s5, %s1307_s11  ;;  %vm1176_vm2 = vcmask 64512  }
  0x10   : > { %s1428_s6 = scalar_lea.vmem %s2501_s0, %s1311_s28 }
  0x11   : > { %v1437_v10 = vld [vmem:[%s1428_s6 + $0xc0] sm:$0xff]  ;;  %v246_v11 = vld [vmem:[%s1428_s6 + $0xd8] sm:$0xff]  ;;  %v1441_v12 = vld [vmem:[%s1428_s6 + $0xf0] sm:$0xff] }
  0x12   : > { %2577 = vst [vmem:[#allocation2_spill] sm:$0xff] %v1437_v10  ;;  %v281_v15 = vmul.f32 %v1419_v4, %v1437_v10  ;;  %v314_v16 = vmul.f32 %v1421_v5, %v246_v11  ;;  %v379_v17 = vmul.f32 %v1423_v6, %v1441_v12  ;;  %v1453_v18 = vld [vmem:[%s1428_s6 + $0xc1] sm:$0xff]  ;;  %v1456_v19 = vld [vmem:[%s1428_s6 + $0xd9] sm:$0xff]  ;;  %v1459_v20 = vld [vmem:[%s1428_s6 + $0xf1] sm:$0xff]  ;;  %v1473_v25 = vmul.f32 %v1419_v4, %v246_v11 }
  0x13   : > { %2578 = vst [vmem:[#allocation3_spill] sm:$0xff] %v1441_v12  ;;  %v1464_v22 = vld [vmem:[%s1428_s6 + $0xc2] sm:$0xff]  ;;  %v1467_v23 = vld [vmem:[%s1428_s6 + $0xda] sm:$0xff]  ;;  %v1470_v24 = vld [vmem:[%s1428_s6 + $0xf2] sm:$0xff]  ;;  %v480_v27 = vmul.f32 %v1430_v7, %v1453_v18  ;;  %v545_v28 = vmul.f32 %v1432_v8, %v1456_v19  ;;  %v610_v29 = vmul.f32 %v1434_v9, %v1459_v20  ;;  %v1507_v39 = vmul.f32 %v1421_v5, %v1441_v12 }
  0x14   : > { %2579 = vst [vmem:[#allocation4_spill] sm:$0xff] %v1453_v18  ;;  %v346_v26 = vadd.f32 %v314_v16, %v281_v15  ;;  %v1482_v30 = vld [vmem:[%s1428_s6 + $0x120] sm:$0xff]  ;;  %v1485_v31 = vld [vmem:[%s1428_s6 + $0x138] sm:$0xff]  ;;  %v1488_v32 = vld [vmem:[%s1428_s6 + $0x150] sm:$0xff]  ;;  %v711_v41 = vmul.f32 %v1443_v13, %v1464_v22  ;;  %v1513_v42 = vmul.f32 %v1445_v14, %v1467_v23  ;;  %v1517_v43 = vmul.f32 %v1461_v21, %v1470_v24 }
  0x15   : > { %2580 = vst [vmem:[#allocation5_spill] sm:$0xff] %v1464_v22  ;;  %v289_v33 = vmul.f32 %v1419_v4, %v1482_v30  ;;  %v322_v34 = vmul.f32 %v1421_v5, %v1485_v31  ;;  %v387_v35 = vmul.f32 %v1423_v6, %v1488_v32  ;;  %v1497_v36 = vld [vmem:[%s1428_s6 + $0x121] sm:$0xff]  ;;  %v1500_v37 = vld [vmem:[%s1428_s6 + $0x139] sm:$0xff]  ;;  %v1503_v38 = vld [vmem:[%s1428_s6 + $0x151] sm:$0xff] }
  0x16   : > { %2581 = vst [vmem:[#allocation6_spill] sm:$0xff] %v1482_v30  ;;  %v411_v40 = vadd.f32 %v379_v17, %v346_v26  ;;  %v1520_v44 = vld [vmem:[%s1428_s6 + $0x122] sm:$0xff]  ;;  %v1523_v45 = vld [vmem:[%s1428_s6 + $0x13a] sm:$0xff]  ;;  %v1526_v46 = vld [vmem:[%s1428_s6 + $0x152] sm:$0xff]  ;;  %v488_v48 = vmul.f32 %v1430_v7, %v1497_v36  ;;  %v553_v49 = vmul.f32 %v1432_v8, %v1500_v37  ;;  %v618_v50 = vmul.f32 %v1434_v9, %v1503_v38 }
  0x17   : > { %2582 = vst [vmem:[#allocation7_spill] sm:$0xff] %v1497_v36  ;;  %v354_v47 = vadd.f32 %v322_v34, %v289_v33  ;;  %v228_v51 = vld [vmem:[%s1428_s6] sm:$0xff]  ;;  %v1536_v52 = vld [vmem:[%s1428_s6 + $0x18] sm:$0xff]  ;;  %v1539_v53 = vld [vmem:[%s1428_s6 + $0x30] sm:$0xff]  ;;  %v719_v62 = vmul.f32 %v1443_v13, %v1520_v44  ;;  %v784_v63 = vmul.f32 %v1445_v14, %v1523_v45  ;;  %v1559_v0 = vmul.f32 %v1461_v21, %v1526_v46 }
  0x18   : > { %2583 = vst [vmem:[#allocation8_spill] sm:$0xff] %v1520_v44  ;;  %v512_v54 = vadd.f32 %v480_v27, %v411_v40  ;;  %v265_v55 = vmul.f32 %v1419_v4, %v228_v51  ;;  %v298_v56 = vmul.f32 %v1421_v5, %v1536_v52  ;;  %v363_v57 = vmul.f32 %v1423_v6, %v1539_v53  ;;  %v427_v58 = vld [vmem:[%s1428_s6 + $0x1] sm:$0xff]  ;;  %v1548_v59 = vld [vmem:[%s1428_s6 + $0x19] sm:$0xff]  ;;  %v1551_v60 = vld [vmem:[%s1428_s6 + $0x31] sm:$0xff] }
  0x19   : > { %2584 = vst [vmem:[#allocation9_spill] sm:$0xff] %v1539_v53  ;;  %v419_v61 = vadd.f32 %v387_v35, %v354_v47  ;;  %v658_v1 = vld [vmem:[%s1428_s6 + $0x2] sm:$0xff]  ;;  %v1563_v2 = vld [vmem:[%s1428_s6 + $0x1a] sm:$0xff]  ;;  %v464_v15 = vmul.f32 %v1430_v7, %v427_v58  ;;  %v529_v16 = vmul.f32 %v1432_v8, %v1548_v59  ;;  %v1575_v27 = vld [vmem:[%s1428_s6 + $0x90] sm:$0xff]  ;;  %v594_v34 = vmul.f32 %v1434_v9, %v1551_v60 }
  0x1a   : > { %v577_v3 = vadd.f32 %v545_v28, %v512_v54  ;;  %v330_v11 = vadd.f32 %v298_v56, %v265_v55  ;;  %v1569_v17 = vld [vmem:[%s1428_s6 + $0x60] sm:$0xff]  ;;  %v1572_v26 = vld [vmem:[%s1428_s6 + $0x78] sm:$0xff]  ;;  %v695_v55 = vmul.f32 %v1443_v13, %v658_v1  ;;  %v371_v56 = vmul.f32 %v1423_v6, %v1575_v27 }
  0x1b   : > { %2585 = vst [vmem:[#allocation10_spill] sm:$0xff] %v1569_v17  ;;  %v520_v33 = vadd.f32 %v488_v48, %v419_v61  ;;  %v1580_v35 = vld [vmem:[%s1428_s6 + $0x32] sm:$0xff]  ;;  %v273_v28 = vmul.f32 %v1419_v4, %v1569_v17  ;;  %v306_v40 = vmul.f32 %v1421_v5, %v1572_v26  ;;  %v1587_v47 = vld [vmem:[%s1428_s6 + $0x61] sm:$0xff]  ;;  %v760_v22 = vmul.f32 %v1445_v14, %v1563_v2 }
  0x1c   : > { %2586 = vst [vmem:[#allocation11_spill] sm:$0xff] %v1587_v47  ;;  %v1590_v51 = vld [vmem:[%s1428_s6 + $0x79] sm:$0xff]  ;;  %v642_v54 = vadd.f32 %v610_v29, %v577_v3  ;;  %v395_v48 = vadd.f32 %v363_v57, %v330_v11  ;;  %v1596_v58 = vld [vmem:[%s1428_s6 + $0x91] sm:$0xff]  ;;  %v472_v29 = vmul.f32 %v1430_v7, %v1587_v47  ;;  %v1603_v57 = vld [vmem:[%s1428_s6 + $0xc8] sm:$0xff] }
  0x1d   : > { %v585_v61 = vadd.f32 %v553_v49, %v520_v33  ;;  %v338_v18 = vadd.f32 %v306_v40, %v273_v28  ;;  %2587 = vst [vmem:[#allocation12_spill] sm:$0xff] %v1603_v57  ;;  %v1606_v3 = vld [vmem:[%s1428_s6 + $0xe0] sm:$0xff]  ;;  %v1609_v1 = vld [vmem:[%s1428_s6 + $0xf8] sm:$0xff]  ;;  %v825_v49 = vmul.f32 %v1461_v21, %v1580_v35  ;;  %v537_v33 = vmul.f32 %v1432_v8, %v1590_v51 }
  0x1e   : > { %2588 = vst [vmem:[#allocation13_spill] sm:$0xff] %v1606_v3  ;;  %v743_v11 = vadd.f32 %v711_v41, %v642_v54  ;;  %v496_v10 = vadd.f32 %v464_v15, %v395_v48  ;;  %v1616_v28 = vld [vmem:[%s1428_s6 + $0x62] sm:$0xff]  ;;  %v1619_v40 = vld [vmem:[%s1428_s6 + $0x7a] sm:$0xff]  ;;  %v602_v17 = vmul.f32 %v1434_v9, %v1596_v58  ;;  %v282_v41 = vmul.f32 %v1419_v4, %v1603_v57 }
  0x1f   : > { %2589 = vst [vmem:[#allocation14_spill] sm:$0xff] %v1609_v1  ;;  %v650_v47 = vadd.f32 %v618_v50, %v585_v61  ;;  %v403_v44 = vadd.f32 %v371_v56, %v338_v18  ;;  %v1626_v15 = vld [vmem:[%s1428_s6 + $0xc9] sm:$0xff]  ;;  %v1632_v48 = vld [vmem:[%s2503_s2] ss:$0 sm:$0xff]  ;;  %v1635_v61 = vld [vmem:[%s1428_s6 + $0x92] sm:$0xff]  ;;  %v315_v18 = vmul.f32 %v1421_v5, %v1606_v3  ;;  %v380_v56 = vmul.f32 %v1423_v6, %v1609_v1 }
  0x20   : > { %2590 = vst [vmem:[#allocation15_spill] sm:$0xff] %v1616_v28  ;;  %v808_v54 = vadd.f32 %v1513_v42, %v743_v11  ;;  %v561_v50 = vadd.f32 %v529_v16, %v496_v10  ;;  %v1642_v57 = vld [vmem:[%s1428_s6 + $0xe1] sm:$0xff]  ;;  %v703_v36 = vmul.f32 %v1443_v13, %v1616_v28  ;;  %v768_v30 = vmul.f32 %v1445_v14, %v1619_v40  ;;  %v1649_v10 = vld [vmem:[%s1428_s6 + $0xf9] sm:$0xff] }
  0x21   : > { %2591 = vst [vmem:[#allocation16_spill] sm:$0xff] %v1619_v40  ;;  %v751_v42 = vadd.f32 %v719_v62, %v650_v47  ;;  %v504_v11 = vadd.f32 %v472_v29, %v403_v44  ;;  %v347_v3 = vadd.f32 %v315_v18, %v282_v41  ;;  %v481_v1 = vmul.f32 %v1430_v7, %v1626_v15  ;;  %v1655_v62 = vld [vmem:[%s1428_s6 + $0x128] sm:$0xff]  ;;  %v1658_v44 = vld [vmem:[%s1428_s6 + $0x140] sm:$0xff] }
  0x22   : > { %2592 = vst [vmem:[#allocation17_spill] sm:$0xff] %v1626_v15  ;;  %v873_v16 = vadd.f32 %v1517_v43, %v808_v54  ;;  %v626_v12 = vadd.f32 %v594_v34, %v561_v50  ;;  %v833_v28 = vmul.f32 %v1461_v21, %v1635_v61  ;;  %v546_v40 = vmul.f32 %v1432_v8, %v1642_v57  ;;  %v1665_v43 = vld [vmem:[%s1428_s6 + $0x158] sm:$0xff]  ;;  %v1671_v18 = vld [vmem:[%s1428_s6 + $0x129] sm:$0xff] }
  0x23   : > { %2593 = vst [vmem:[#allocation18_spill] sm:$0xff] %v1649_v10  ;;  %v816_v47 = vadd.f32 %v784_v63, %v751_v42  ;;  %v569_v29 = vadd.f32 %v537_v33, %v504_v11  ;;  %v412_v54 = vadd.f32 %v380_v56, %v347_v3  ;;  %v611_v50 = vmul.f32 %v1434_v9, %v1649_v10  ;;  %v1675_v42 = vld [vmem:[%s1428_s6 + $0xca] sm:$0xff]  ;;  %v1678_v11 = vld [vmem:[%s1428_s6 + $0xe2] sm:$0xff]  ;;  %v1694_v10 = vld [vmem:[%s1428_s6 + $0x159] sm:$0xff] }
  0x24   : > { %2594 = vst [vmem:[#allocation19_spill] sm:$0xff] %v1655_v62  ;;  %v909_v34 = vadd.f32 %v1632_v48, %v873_v16  ;;  %v727_v41 = vadd.f32 %v695_v55, %v626_v12  ;;  %v290_v15 = vmul.f32 %v1419_v4, %v1655_v62  ;;  %v323_v12 = vmul.f32 %v1421_v5, %v1658_v44 }
  0x25   : > { %2595 = vst [vmem:[#allocation20_spill] sm:$0xff] %v1665_v43  ;;  %v881_v63 = vadd.f32 %v1559_v0, %v816_v47  ;;  %v634_v33 = vadd.f32 %v602_v17, %v569_v29  ;;  %v513_v56 = vadd.f32 %v481_v1, %v412_v54  ;;  %v388_v16 = vmul.f32 %v1423_v6, %v1665_v43  ;;  %v1687_v0 = vld [vmem:[%s1428_s6 + $0x141] sm:$0xff] }
  0x26   : > { %2596 = vst [vmem:[#allocation21_spill] sm:$0xff] %v1671_v18  ;;  %v941_v55 = vmax.f32 %v909_v34, 0.0  ;;  %v792_v3 = vadd.f32 %v760_v22, %v727_v41  ;;  %v1691_v29 = vld [vmem:[%s1428_s6 + $0xfa] sm:$0xff]  ;;  %v355_v62 = vadd.f32 %v323_v12, %v290_v15  ;;  %v489_v22 = vmul.f32 %v1430_v7, %v1671_v18  ;;  %v229_v54 = vld [vmem:[%s1428_s6 + $0x8] sm:$0xff] }
  0x27   : > { %2597 = vst [vmem:[#allocation22_spill] sm:$0xff] %v1675_v42  ;;  %v917_v17 = vadd.f32 %v1632_v48, %v881_v63  ;;  %v735_v47 = vadd.f32 %v703_v36, %v634_v33  ;;  %v578_v34 = vadd.f32 %v546_v40, %v513_v56  ;;  %v712_v41 = vmul.f32 %v1443_v13, %v1675_v42  ;;  %v1705_v63 = vld [vmem:[%s1428_s6 + $0x20] sm:$0xff]  ;;  %v1713_v40 = vld [vmem:[%s1428_s6 + $0x38] sm:$0xff] }
  0x28   : > { %2598 = vst [vmem:[#allocation23_spill] sm:$0xff] %v1678_v11  ;;  %1289 = vmatmul.msk.f32.vlgmr.msra.gmra.mxu2 %vm962_vm1, %v941_v55  ;;  %v857_v1 = vadd.f32 %v825_v49, %v792_v3  ;;  %v777_v36 = vmul.f32 %v1445_v14, %v1678_v11  ;;  %v420_v12 = vadd.f32 %v388_v16, %v355_v62  ;;  %v1710_v49 = vld [vmem:[%s1428_s6 + $0x12a] sm:$0xff]  ;;  %v1723_v16 = vld [vmem:[%s1428_s6 + $0x142] sm:$0xff] }
  0x29   : > { %2599 = vst [vmem:[#allocation24_spill] sm:$0xff] %v1691_v29  ;;  %v949_v15 = vmax.f32 %v917_v17, 0.0  ;;  %v800_v33 = vadd.f32 %v768_v30, %v735_v47  ;;  %v554_v55 = vmul.f32 %v1432_v8, %v1687_v0  ;;  %v643_v56 = vadd.f32 %v611_v50, %v578_v34  ;;  %v428_v17 = vld [vmem:[%s1428_s6 + $0x9] sm:$0xff]  ;;  %v1726_v47 = vld [vmem:[%s1428_s6 + $0x15a] sm:$0xff] }
  0x2a   : > { %2600 = vst [vmem:[#allocation25_spill] sm:$0xff] %v1694_v10  ;;  %v893_v3 = vadd.f32 %v1632_v48, %v857_v1  ;;  %v842_v42 = vmul.f32 %v1461_v21, %v1691_v29  ;;  %v619_v18 = vmul.f32 %v1434_v9, %v1694_v10  ;;  %v521_v62 = vadd.f32 %v489_v22, %v420_v12  ;;  %v1736_v22 = vld [vmem:[%s1428_s6 + $0x21] sm:$0xff] }
  0x2b   : > { %2601 = vst [vmem:[#allocation26_spill] sm:$0xff] %v1705_v63  ;;  %1297 = vmatmul.msk.f32.vlgmr.msra.gmra.mxu3 %vm962_vm1, %v949_v15  ;;  %v865_v30 = vadd.f32 %v833_v28, %v800_v33  ;;  %v266_v50 = vmul.f32 %v1419_v4, %v229_v54  ;;  %v299_v1 = vmul.f32 %v1421_v5, %v1705_v63 }
  0x2c   : > { %2602 = vst [vmem:[#allocation27_spill] sm:$0xff] %v1710_v49  ;;  %v925_v34 = vmax.f32 %v893_v3, 0.0  ;;  %v744_v10 = vadd.f32 %v712_v41, %v643_v56  ;;  %v720_v15 = vmul.f32 %v1443_v13, %v1710_v49  ;;  %v364_v28 = vmul.f32 %v1423_v6, %v1713_v40  ;;  %v1741_v3 = vld [vmem:[%s1428_s6 + $0x68] sm:$0xff]  ;;  %v1744_v41 = vld [vmem:[%s1428_s6 + $0x80] sm:$0xff]  ;;  %v1747_v56 = vld [vmem:[%s1428_s6 + $0x98] sm:$0xff] }
  0x2d   : > { %2603 = vst [vmem:[#allocation28_spill] sm:$0xff] %v1713_v40  ;;  %v901_v33 = vadd.f32 %v1632_v48, %v865_v30  ;;  %v586_v12 = vadd.f32 %v554_v55, %v521_v62  ;;  %v331_v29 = vadd.f32 %v299_v1, %v266_v50  ;;  %v465_v54 = vmul.f32 %v1430_v7, %v428_v17  ;;  %v1755_v30 = vld [vmem:[%s1428_s6 + $0x39] sm:$0xff]  ;;  %v659_v17 = vld [vmem:[%s1428_s6 + $0xa] sm:$0xff] }
  0x2e   : > { %2604 = vst [vmem:[#allocation29_spill] sm:$0xff] %v1723_v16  ;;  %1273 = vmatmul.msk.f32.vlgmr.msra.gmra.mxu0 %vm962_vm1, %v925_v34  ;;  %v809_v49 = vadd.f32 %v777_v36, %v744_v10  ;;  %v785_v40 = vmul.f32 %v1445_v14, %v1723_v16  ;;  %v850_v55 = vmul.f32 %v1461_v21, %v1726_v47  ;;  %v1763_v36 = vld [vmem:[%s1428_s6 + $0x22] sm:$0xff] }
  0x2f   : > { %2605 = vst [vmem:[#allocation30_spill] sm:$0xff] %v1726_v47  ;;  %v348_v62 = vadd.f32 %v1507_v39, %v1473_v25  ;;  %v933_v50 = vmax.f32 %v901_v33, 0.0  ;;  %v651_v1 = vadd.f32 %v619_v18, %v586_v12  ;;  %v396_v63 = vadd.f32 %v364_v28, %v331_v29  ;;  %v1766_v34 = vld [vmem:[%s1428_s6 + $0x69] sm:$0xff]  ;;  %v1769_v47 = vld [vmem:[%s1428_s6 + $0x3a] sm:$0xff] }
  0x30   : > { %2606 = vst [vmem:[#allocation31_spill] sm:$0xff] %v1741_v3  ;;  %v530_v10 = vmul.f32 %v1432_v8, %v1736_v22  ;;  %v874_v16 = vadd.f32 %v842_v42, %v809_v49  ;;  %v274_v11 = vmul.f32 %v1419_v4, %v1741_v3  ;;  %v307_v25 = vmul.f32 %v1421_v5, %v1744_v41  ;;  %v1778_v18 = vld [vmem:[%s1428_s6 + $0x81] sm:$0xff] }
  0x31   : > { %2607 = vst [vmem:[#allocation32_spill] sm:$0xff] %v1744_v41  ;;  %v372_v39 = vmul.f32 %v1423_v6, %v1747_v56  ;;  %1281 = vmatmul.msk.f32.vlgmr.msra.gmra.mxu1 %vm962_vm1, %v933_v50  ;;  %v752_v29 = vadd.f32 %v720_v15, %v651_v1  ;;  %v497_v28 = vadd.f32 %v465_v54, %v396_v63  ;;  %v1785_v33 = vld [vmem:[%s1428_s6 + $0x108] sm:$0xff]  ;;  %v1791_v41 = vld [vmem:[%s1428_s6 + $0x99] sm:$0xff] }
  0x32   : > { %2608 = vst [vmem:[#allocation33_spill] sm:$0xff] %v1747_v56  ;;  %v595_v42 = vmul.f32 %v1434_v9, %v1755_v30  ;;  %v696_v49 = vmul.f32 %v1443_v13, %v659_v17  ;;  %v910_v12 = vadd.f32 %v1632_v48, %v874_v16  ;;  %v761_v3 = vmul.f32 %v1445_v14, %v1763_v36  ;;  %v1796_v63 = vld [vmem:[%s1428_s6 + $0x6a] sm:$0xff]  ;;  %v1803_v1 = vld [vmem:[%s1428_s6 + $0x82] sm:$0xff] }
  0x33   : > { %2609 = vst [vmem:[#allocation34_spill] sm:$0xff] %v1763_v36  ;;  %v339_v56 = vadd.f32 %v307_v25, %v274_v11  ;;  %v473_v15 = vmul.f32 %v1430_v7, %v1766_v34  ;;  %v817_v54 = vadd.f32 %v785_v40, %v752_v29  ;;  %v562_v50 = vadd.f32 %v530_v10, %v497_v28 }
  0x34   : > { %2610 = vst [vmem:[#allocation35_spill] sm:$0xff] %v1766_v34  ;;  %v826_v17 = vmul.f32 %v1461_v21, %v1769_v47  ;;  %v538_v16 = vmul.f32 %v1432_v8, %v1778_v18  ;;  %v942_v11 = vmax.f32 %v910_v12, 0.0  ;;  %v381_v36 = vmul.f32 %v1423_v6, %v1785_v33  ;;  %v1808_v34 = vld [vmem:[%s1428_s6 + $0x109] sm:$0xff] }
  0x35   : > { %2611 = vst [vmem:[#allocation36_spill] sm:$0xff] %v1769_v47  ;;  %v404_v25 = vadd.f32 %v372_v39, %v339_v56  ;;  %v482_v40 = vmul.f32 %v1430_v7, %v1456_v19  ;;  %v882_v10 = vadd.f32 %v850_v55, %v817_v54  ;;  %v627_v29 = vadd.f32 %v595_v42, %v562_v50  ;;  %v1821_v39 = vld [vmem:[%s1428_s6 + $0x9a] sm:$0xff] }
  0x36   : > { %2612 = vst [vmem:[#allocation37_spill] sm:$0xff] %v1778_v18  ;;  %v603_v28 = vmul.f32 %v1434_v9, %v1791_v41  ;;  %v704_v47 = vmul.f32 %v1443_v13, %v1796_v63  ;;  %v1817_v18 = vld [vmem:[%s1428_s6 + $0x168] sm:$0xff]  ;;  %1290 = vmatmul.msk.f32.gmra.mxu2 %vm962_vm1, %v942_v11  ;;  %v769_v12 = vmul.f32 %v1445_v14, %v1803_v1 }
  0x37   : > { %2613 = vst [vmem:[#allocation38_spill] sm:$0xff] %v1791_v41  ;;  %v505_v56 = vadd.f32 %v473_v15, %v404_v25  ;;  %v413_v19 = vadd.f32 %v381_v36, %v348_v62  ;;  %v547_v55 = vmul.f32 %v1432_v8, %v1459_v20  ;;  %v918_v42 = vadd.f32 %v1632_v48, %v882_v10 }
  0x38   : > { %2614 = vst [vmem:[#allocation39_spill] sm:$0xff] %v1796_v63  ;;  %v728_v54 = vadd.f32 %v696_v49, %v627_v29  ;;  %v612_v50 = vmul.f32 %v1434_v9, %v1808_v34  ;;  %v291_v15 = vmul.f32 %v1419_v4, %v1485_v31  ;;  %v1833_v63 = vld [vmem:[%s1428_s6 + $0x10a] sm:$0xff]  ;;  %v324_v62 = vmul.f32 %v1421_v5, %v1488_v32 }
  0x39   : > { %2615 = vst [vmem:[#allocation40_spill] sm:$0xff] %v1803_v1  ;;  %v570_v11 = vadd.f32 %v538_v16, %v505_v56  ;;  %v514_v25 = vadd.f32 %v482_v40, %v413_v19  ;;  %v389_v36 = vmul.f32 %v1423_v6, %v1817_v18  ;;  %v950_v10 = vmax.f32 %v918_v42, 0.0  ;;  %v1844_v40 = vld [vmem:[%s1428_s6 + $0x169] sm:$0xff] }
  0x3a   : > { %2616 = vst [vmem:[#allocation41_spill] sm:$0xff] %v1808_v34  ;;  %v793_v1 = vadd.f32 %v761_v3, %v728_v54  ;;  %v834_v49 = vmul.f32 %v1461_v21, %v1821_v39  ;;  %v713_v29 = vmul.f32 %v1443_v13, %v1467_v23  ;;  %v356_v16 = vadd.f32 %v324_v62, %v291_v15  ;;  %v1849_v19 = vld [vmem:[%s1428_s6 + $0x48] sm:$0xff] }
  0x3b   : > { %v635_v34 = vadd.f32 %v603_v28, %v570_v11  ;;  %v579_v31 = vadd.f32 %v547_v55, %v514_v25  ;;  %2617 = vst [vmem:[#allocation42_spill] sm:$0xff] %v1844_v40  ;;  %v490_v56 = vmul.f32 %v1430_v7, %v1500_v37  ;;  %1298 = vmatmul.msk.f32.gmra.mxu3 %vm962_vm1, %v950_v10 }
  0x3c   : > { %2618 = vst [vmem:[#allocation43_spill] sm:$0xff] %v1849_v19  ;;  %v858_v3 = vadd.f32 %v826_v17, %v793_v1  ;;  %v778_v42 = vmul.f32 %v1445_v14, %v1470_v24  ;;  %v843_v23 = vmul.f32 %v1461_v21, %v1833_v63  ;;  %v555_v28 = vmul.f32 %v1432_v8, %v1503_v38  ;;  %v1864_v1 = vld [vmem:[%s1428_s6 + $0x16a] sm:$0xff] }
  0x3d   : > { %v736_v55 = vadd.f32 %v704_v47, %v635_v34  ;;  %v644_v54 = vadd.f32 %v612_v50, %v579_v31  ;;  %v421_v15 = vadd.f32 %v389_v36, %v356_v16  ;;  %v267_v37 = vmul.f32 %v1419_v4, %v1536_v52 }
  0x3e   : > { %v894_v11 = vadd.f32 %v1632_v48, %v858_v3  ;;  %v620_v17 = vmul.f32 %v1434_v9, %v1844_v40  ;;  %v300_v25 = vmul.f32 %v1421_v5, %v1539_v53  ;;  %v365_v47 = vmul.f32 %v1423_v6, %v1849_v19  ;;  %v1877_v3 = vld [vmem:[%s1428_s6 + $0xa8] sm:$0xff] }
  0x3f   : > { %v801_v34 = vadd.f32 %v769_v12, %v736_v55  ;;  %v745_v50 = vadd.f32 %v713_v29, %v644_v54  ;;  %v522_v62 = vadd.f32 %v490_v56, %v421_v15  ;;  %v721_v52 = vmul.f32 %v1443_v13, %v1523_v45  ;;  %v1882_v29 = vld [vmem:[%s1428_s6 + $0x49] sm:$0xff] }
  0x40   : > { %v926_v36 = vmax.f32 %v894_v11, 0.0  ;;  %v786_v10 = vmul.f32 %v1445_v14, %v1526_v46  ;;  %v332_v31 = vadd.f32 %v300_v25, %v267_v37  ;;  %v466_v16 = vmul.f32 %v1430_v7, %v1548_v59  ;;  %v1897_v25 = vld [vmem:[%s1428_s6 + $0xa9] sm:$0xff] }
  0x41   : > { %v866_v53 = vadd.f32 %v834_v49, %v801_v34  ;;  %v810_v40 = vadd.f32 %v778_v42, %v745_v50  ;;  %v587_v19 = vadd.f32 %v555_v28, %v522_v62  ;;  %v851_v12 = vmul.f32 %v1461_v21, %v1864_v1 }
  0x42   : > { %1274 = vmatmul.msk.f32.gmra.mxu0 %vm962_vm1, %v926_v36  ;;  %v397_v45 = vadd.f32 %v365_v47, %v332_v31  ;;  %v531_v56 = vmul.f32 %v1432_v8, %v1551_v60  ;;  %v275_v59 = vmul.f32 %v1419_v4, %v1572_v26  ;;  %v308_v49 = vmul.f32 %v1421_v5, %v1575_v27 }
  0x43   : > { %v902_v42 = vadd.f32 %v1632_v48, %v866_v53  ;;  %v875_v28 = vadd.f32 %v843_v23, %v810_v40  ;;  %v652_v55 = vadd.f32 %v620_v17, %v587_v19  ;;  %v373_v54 = vmul.f32 %v1423_v6, %v1877_v3  ;;  %v1905_v19 = vld [vmem:[%s1428_s6 + $0x110] sm:$0xff] }
  0x44   : > { %v498_v15 = vadd.f32 %v466_v16, %v397_v45  ;;  %v596_v37 = vmul.f32 %v1434_v9, %v1882_v29  ;;  %v340_v11 = vadd.f32 %v308_v49, %v275_v59  ;;  %v474_v26 = vmul.f32 %v1430_v7, %v1590_v51  ;;  %v1908_v17 = vld [vmem:[%s1428_s6 + $0x4a] sm:$0xff]  ;;  %v2621_v49 = vld [vmem:[#allocation14_spill] sm:$0xff] }
  0x45   : > { %v934_v47 = vmax.f32 %v902_v42, 0.0  ;;  %v911_v34 = vadd.f32 %v1632_v48, %v875_v28  ;;  %v753_v53 = vadd.f32 %v721_v52, %v652_v55  ;;  %v697_v40 = vmul.f32 %v1443_v13, %v1563_v2  ;;  %v2619_v52 = vld [vmem:[#allocation13_spill] sm:$0xff]  ;;  %v1920_v59 = vld [vmem:[%s1428_s6 + $0xaa] sm:$0xff] }
  0x46   : > { %v563_v23 = vadd.f32 %v531_v56, %v498_v15  ;;  %v762_v50 = vmul.f32 %v1445_v14, %v1580_v35  ;;  %v405_v62 = vadd.f32 %v373_v54, %v340_v11  ;;  %v539_v51 = vmul.f32 %v1432_v8, %v1596_v58  ;;  %2620 = vst [vmem:[#allocation13_spill] sm:$0xff] %v1920_v59  ;;  %v2622_v54 = vld [vmem:[#allocation16_spill] sm:$0xff] }
  0x47   : > { %1282 = vmatmul.msk.f32.gmra.mxu1 %vm962_vm1, %v934_v47  ;;  %v943_v36 = vmax.f32 %v911_v34, 0.0  ;;  %v818_v31 = vadd.f32 %v786_v10, %v753_v53  ;;  %v604_v2 = vmul.f32 %v1434_v9, %v1897_v25  ;;  %v284_v16 = vmul.f32 %v1419_v4, %v2619_v52  ;;  %v1934_v34 = vld [vmem:[%s1428_s6 + $0x111] sm:$0xff] }
  0x48   : > { %v628_v45 = vadd.f32 %v596_v37, %v563_v23  ;;  %v506_v56 = vadd.f32 %v474_v26, %v405_v62  ;;  %v317_v42 = vmul.f32 %v1421_v5, %v2621_v49  ;;  %v382_v28 = vmul.f32 %v1423_v6, %v1905_v19  ;;  %v1939_v23 = vld [vmem:[%s1428_s6 + $0x170] sm:$0xff] }
  0x49   : > { %1291 = vmatmul.msk.f32.gmra.mxu2 %vm962_vm1, %v943_v36  ;;  %v883_v10 = vadd.f32 %v851_v12, %v818_v31  ;;  %v827_v55 = vmul.f32 %v1461_v21, %v1908_v17  ;;  %v705_v15 = vmul.f32 %v1443_v13, %v2622_v54  ;;  %v770_v37 = vmul.f32 %v1445_v14, %v1635_v61  ;;  %v2624_v36 = vld [vmem:[#allocation18_spill] sm:$0xff] }
  0x4a   : > { %v729_v11 = vadd.f32 %v697_v40, %v628_v45  ;;  %v571_v26 = vadd.f32 %v539_v51, %v506_v56  ;;  %v349_v47 = vadd.f32 %v317_v42, %v284_v16  ;;  %v483_v53 = vmul.f32 %v1430_v7, %v1642_v57  ;;  %2623 = vst [vmem:[#allocation14_spill] sm:$0xff] %v1939_v23  ;;  %v1949_v45 = vld [vmem:[%s1428_s6 + $0x112] sm:$0xff] }
  0x4b   : > { %v919_v12 = vadd.f32 %v1632_v48, %v883_v10  ;;  %v835_v62 = vmul.f32 %v1461_v21, %v1920_v59  ;;  %v548_v31 = vmul.f32 %v1432_v8, %v2624_v36  ;;  %v292_v40 = vmul.f32 %v1419_v4, %v1658_v44  ;;  %2625 = vst [vmem:[#allocation16_spill] sm:$0xff] %v1949_v45 }
  0x4c   : > { %v794_v51 = vadd.f32 %v762_v50, %v729_v11  ;;  %v636_v52 = vadd.f32 %v604_v2, %v571_v26  ;;  %v414_v16 = vadd.f32 %v382_v28, %v349_v47  ;;  %v325_v57 = vmul.f32 %v1421_v5, %v1665_v43  ;;  %v1960_v28 = vld [vmem:[%s1428_s6 + $0x171] sm:$0xff]  ;;  %v2627_v26 = vld [vmem:[#allocation23_spill] sm:$0xff] }
  0x4d   : > { %v951_v56 = vmax.f32 %v919_v12, 0.0  ;;  %v613_v42 = vmul.f32 %v1434_v9, %v1934_v34  ;;  %v390_v10 = vmul.f32 %v1423_v6, %v1939_v23  ;;  %v491_v54 = vmul.f32 %v1430_v7, %v1687_v0  ;;  %2626 = vst [vmem:[#allocation18_spill] sm:$0xff] %v1960_v28  ;;  %v1963_v11 = vld [vmem:[%s1428_s6 + $0x50] sm:$0xff] }
  0x4e   : > { %v859_v59 = vadd.f32 %v827_v55, %v794_v51  ;;  %v737_v44 = vadd.f32 %v705_v15, %v636_v52  ;;  %v515_v50 = vadd.f32 %v483_v53, %v414_v16  ;;  %v357_v2 = vadd.f32 %v325_v57, %v292_v40  ;;  %v2628_v12 = vld [vmem:[#allocation24_spill] sm:$0xff]  ;;  %v2629_v55 = vld [vmem:[#allocation25_spill] sm:$0xff] }
  0x4f   : > { %1299 = vmatmul.msk.f32.gmra.mxu3 %vm962_vm1, %v951_v56  ;;  %v714_v47 = vmul.f32 %v1443_v13, %v2627_v26  ;;  %v779_v23 = vmul.f32 %v1445_v14, %v2628_v12  ;;  %v844_v0 = vmul.f32 %v1461_v21, %v1949_v45  ;;  %v556_v15 = vmul.f32 %v1432_v8, %v2629_v55  ;;  %v1978_v57 = vld [vmem:[%s1428_s6 + $0x172] sm:$0xff]  ;;  %v2631_v56 = vld [vmem:[#allocation26_spill] sm:$0xff] }
  0x50   : > { %v895_v53 = vadd.f32 %v1632_v48, %v859_v59  ;;  %v802_v40 = vadd.f32 %v770_v37, %v737_v44  ;;  %v580_v51 = vadd.f32 %v548_v31, %v515_v50  ;;  %v422_v52 = vadd.f32 %v390_v10, %v357_v2  ;;  %2630 = vst [vmem:[#allocation23_spill] sm:$0xff] %v1978_v57  ;;  %v2632_v12 = vld [vmem:[#allocation28_spill] sm:$0xff]  ;;  %v2633_v10 = vld [vmem:[#allocation29_spill] sm:$0xff]  ;;  %v2634_v2 = vld [vmem:[#allocation30_spill] sm:$0xff] }
  0x51   : > { %v621_v16 = vmul.f32 %v1434_v9, %v1960_v28  ;;  %v268_v26 = vmul.f32 %v1419_v4, %v2631_v56  ;;  %v301_v45 = vmul.f32 %v1421_v5, %v2632_v12  ;;  %v366_v55 = vmul.f32 %v1423_v6, %v1963_v11  ;;  %v1993_v12 = vld [vmem:[%s1428_s6 + $0xb0] sm:$0xff] }
  0x52   : > { %v927_v59 = vmax.f32 %v895_v53, 0.0  ;;  %v867_v37 = vadd.f32 %v835_v62, %v802_v40  ;;  %v645_v44 = vadd.f32 %v613_v42, %v580_v51  ;;  %v523_v31 = vadd.f32 %v491_v54, %v422_v52  ;;  %2635 = vst [vmem:[#allocation26_spill] sm:$0xff] %v1993_v12  ;;  %v2000_v40 = vld [vmem:[%s1428_s6 + $0x51] sm:$0xff] }
  0x53   : > { %v722_v50 = vmul.f32 %v1443_v13, %v2633_v10  ;;  %v787_v28 = vmul.f32 %v1445_v14, %v2634_v2  ;;  %v333_v43 = vadd.f32 %v301_v45, %v268_v26  ;;  %v467_v56 = vmul.f32 %v1430_v7, %v1736_v22  ;;  %v2636_v52 = vld [vmem:[#allocation32_spill] sm:$0xff]  ;;  %v2637_v26 = vld [vmem:[#allocation33_spill] sm:$0xff] }
  0x54   : > { %1275 = vmatmul.msk.f32.gmra.mxu0 %vm962_vm1, %v927_v59  ;;  %v903_v53 = vadd.f32 %v1632_v48, %v867_v37  ;;  %v746_v62 = vadd.f32 %v714_v47, %v645_v44  ;;  %v588_v42 = vadd.f32 %v556_v15, %v523_v31  ;;  %v852_v54 = vmul.f32 %v1461_v21, %v1978_v57  ;;  %v2009_v15 = vld [vmem:[%s1428_s6 + $0x52] sm:$0xff] }
  0x55   : > { %v398_v51 = vadd.f32 %v366_v55, %v333_v43  ;;  %v532_v45 = vmul.f32 %v1432_v8, %v1755_v30  ;;  %v276_v22 = vmul.f32 %v1419_v4, %v2636_v52  ;;  %v309_v59 = vmul.f32 %v1421_v5, %v2637_v26  ;;  %2638 = vst [vmem:[#allocation29_spill] sm:$0xff] %v2009_v15  ;;  %v2639_v57 = vld [vmem:[#allocation37_spill] sm:$0xff] }
  0x56   : > { %v935_v10 = vmax.f32 %v903_v53, 0.0  ;;  %v811_v37 = vadd.f32 %v779_v23, %v746_v62  ;;  %v653_v47 = vadd.f32 %v621_v16, %v588_v42  ;;  %v374_v44 = vmul.f32 %v1423_v6, %v1993_v12  ;;  %v2640_v23 = vld [vmem:[#allocation34_spill] sm:$0xff]  ;;  %v2641_v62 = vld [vmem:[#allocation36_spill] sm:$0xff] }
  0x57   : > { %v499_v31 = vadd.f32 %v467_v56, %v398_v51  ;;  %v597_v43 = vmul.f32 %v1434_v9, %v2000_v40  ;;  %v341_v55 = vadd.f32 %v309_v59, %v276_v22  ;;  %v475_v52 = vmul.f32 %v1430_v7, %v2639_v57  ;;  %v2023_v12 = vld [vmem:[%s1428_s6 + $0xb1] sm:$0xff] }
  0x58   : > { %1283 = vmatmul.msk.f32.gmra.mxu1 %vm962_vm1, %v935_v10  ;;  %v876_v2 = vadd.f32 %v844_v0, %v811_v37  ;;  %v754_v53 = vadd.f32 %v722_v50, %v653_v47  ;;  %v698_v16 = vmul.f32 %v1443_v13, %v2640_v23  ;;  %v763_v42 = vmul.f32 %v1445_v14, %v2641_v62  ;;  %v2643_v50 = vld [vmem:[#allocation3_spill] sm:$0xff]  ;;  %v2645_v62 = vld [vmem:[#allocation40_spill] sm:$0xff] }
  0x59   : > { %2642 = vst [vmem:[#allocation32_spill] sm:$0xff] %v2023_v12  ;;  %v564_v56 = vadd.f32 %v532_v45, %v499_v31  ;;  %v828_v51 = vmul.f32 %v1461_v21, %v2009_v15  ;;  %v406_v22 = vadd.f32 %v374_v44, %v341_v55  ;;  %v540_v57 = vmul.f32 %v1432_v8, %v1791_v41  ;;  %v2037_v31 = vld [vmem:[%s1428_s6 + $0xb2] sm:$0xff]  ;;  %v2644_v44 = vld [vmem:[#allocation6_spill] sm:$0xff] }
  0x5a   : > { %v912_v0 = vadd.f32 %v1632_v48, %v876_v2  ;;  %v819_v59 = vadd.f32 %v787_v28, %v754_v53  ;;  %v285_v10 = vmul.f32 %v1419_v4, %v2643_v50  ;;  %v318_v37 = vmul.f32 %v1421_v5, %v1785_v33 }
  0x5b   : > { %v629_v47 = vadd.f32 %v597_v43, %v564_v56  ;;  %v507_v23 = vadd.f32 %v475_v52, %v406_v22  ;;  %v605_v45 = vmul.f32 %v1434_v9, %v2023_v12  ;;  %v383_v55 = vmul.f32 %v1423_v6, %v2644_v44  ;;  %v2048_v56 = vld [vmem:[%s1428_s6 + $0x180] sm:$0xff] }
  0x5c   : > { %v944_v15 = vmax.f32 %v912_v0, 0.0  ;;  %v884_v2 = vadd.f32 %v852_v54, %v819_v59  ;;  %v350_v28 = vadd.f32 %v318_v37, %v285_v10  ;;  %v484_v53 = vmul.f32 %v1430_v7, %v1459_v20  ;;  %v2646_v59 = vld [vmem:[#allocation41_spill] sm:$0xff] }
  0x5d   : > { %v730_v50 = vadd.f32 %v698_v16, %v629_v47  ;;  %v572_v41 = vadd.f32 %v540_v57, %v507_v23  ;;  %v706_v43 = vmul.f32 %v1443_v13, %v2645_v62  ;;  %v771_v52 = vmul.f32 %v1445_v14, %v1821_v39  ;;  %v2647_v47 = vld [vmem:[#allocation7_spill] sm:$0xff] }
  0x5e   : > { %1292 = vmatmul.msk.f32.gmra.mxu2 %vm962_vm1, %v944_v15  ;;  %v920_v22 = vadd.f32 %v1632_v48, %v884_v2  ;;  %v836_v54 = vmul.f32 %v1461_v21, %v2037_v31  ;;  %v415_v0 = vadd.f32 %v383_v55, %v350_v28  ;;  %v549_v20 = vmul.f32 %v1432_v8, %v2646_v59 }
  0x5f   : > { %v795_v16 = vadd.f32 %v763_v42, %v730_v50  ;;  %v637_v57 = vadd.f32 %v605_v45, %v572_v41  ;;  %v293_v62 = vmul.f32 %v1419_v4, %v1488_v32  ;;  %v326_v10 = vmul.f32 %v1421_v5, %v1817_v18 }
  0x60   : > { %v952_v37 = vmax.f32 %v920_v22, 0.0  ;;  %v516_v15 = vadd.f32 %v484_v53, %v415_v0  ;;  %v614_v23 = vmul.f32 %v1434_v9, %v2647_v47  ;;  %v391_v44 = vmul.f32 %v1423_v6, %v2048_v56  ;;  %v2072_v53 = vld [vmem:[%s1428_s6 + $0x181] sm:$0xff] }
  0x61   : > { %v860_v55 = vadd.f32 %v828_v51, %v795_v16  ;;  %v738_v2 = vadd.f32 %v706_v43, %v637_v57  ;;  %v358_v28 = vadd.f32 %v326_v10, %v293_v62  ;;  %v492_v41 = vmul.f32 %v1430_v7, %v1503_v38  ;;  %v2648_v43 = vld [vmem:[#allocation42_spill] sm:$0xff]  ;;  %v2649_v16 = vld [vmem:[#allocation9_spill] sm:$0xff]  ;;  %v2650_v57 = vld [vmem:[#allocation43_spill] sm:$0xff] }
  0x62   : > { %1300 = vmatmul.msk.f32.gmra.mxu3 %vm962_vm1, %v952_v37  ;;  %v581_v32 = vadd.f32 %v549_v20, %v516_v15  ;;  %v715_v42 = vmul.f32 %v1443_v13, %v1470_v24  ;;  %v780_v45 = vmul.f32 %v1445_v14, %v1833_v63  ;;  %v557_v0 = vmul.f32 %v1432_v8, %v2648_v43  ;;  %v2651_v62 = vld [vmem:[#allocation10_spill] sm:$0xff] }
  0x63   : > { %v896_v50 = vadd.f32 %v1632_v48, %v860_v55  ;;  %v803_v22 = vadd.f32 %v771_v52, %v738_v2  ;;  %v423_v51 = vadd.f32 %v391_v44, %v358_v28  ;;  %v269_v20 = vmul.f32 %v1419_v4, %v2649_v16  ;;  %v2652_v55 = vld [vmem:[#allocation8_spill] sm:$0xff] }
  0x64   : > { %v646_v38 = vadd.f32 %v614_v23, %v581_v32  ;;  %v302_v24 = vmul.f32 %v1421_v5, %v2650_v57  ;;  %v367_v10 = vmul.f32 %v1423_v6, %v2651_v62  ;;  %v622_v52 = vmul.f32 %v1434_v9, %v2072_v53  ;;  %v2092_v62 = vld [vmem:[%s1428_s6 + $0x182] sm:$0xff] }
  0x65   : > { %v928_v37 = vmax.f32 %v896_v50, 0.0  ;;  %v868_v15 = vadd.f32 %v836_v54, %v803_v22  ;;  %v524_v47 = vadd.f32 %v492_v41, %v423_v51  ;;  %v845_v2 = vmul.f32 %v1461_v21, %v2652_v55 }
  0x66   : > { %v747_v44 = vadd.f32 %v715_v42, %v646_v38  ;;  %v334_v23 = vadd.f32 %v302_v24, %v269_v20  ;;  %v468_v28 = vmul.f32 %v1430_v7, %v1551_v60  ;;  %v723_v54 = vmul.f32 %v1443_v13, %v1526_v46  ;;  %v2653_v20 = vld [vmem:[#allocation2_spill] sm:$0xff] }
  0x67   : > { %1276 = vmatmul.msk.f32.gmra.mxu0 %vm962_vm1, %v928_v37  ;;  %v904_v32 = vadd.f32 %v1632_v48, %v868_v15  ;;  %v589_v16 = vadd.f32 %v557_v0, %v524_v47  ;;  %v788_v41 = vmul.f32 %v1445_v14, %v1864_v1  ;;  %v533_v22 = vmul.f32 %v1432_v8, %v1882_v29 }
  0x68   : > { %v812_v42 = vadd.f32 %v780_v45, %v747_v44  ;;  %v399_v50 = vadd.f32 %v367_v10, %v334_v23  ;;  %v277_v60 = vmul.f32 %v1419_v4, %v1575_v27  ;;  %v310_v0 = vmul.f32 %v1421_v5, %v1877_v3  ;;  %v2654_v10 = vld [vmem:[#allocation11_spill] sm:$0xff] }
  0x69   : > { %v936_v51 = vmax.f32 %v904_v32, 0.0  ;;  %v654_v38 = vadd.f32 %v622_v52, %v589_v16  ;;  %v375_v24 = vmul.f32 %v1423_v6, %v2653_v20  ;;  %v853_v37 = vmul.f32 %v1461_v21, %v2092_v62 }
  0x6a   : > { %v877_v46 = vadd.f32 %v845_v2, %v812_v42  ;;  %v500_v45 = vadd.f32 %v468_v28, %v399_v50  ;;  %v598_v15 = vmul.f32 %v1434_v9, %v2654_v10  ;;  %v699_v27 = vmul.f32 %v1443_v13, %v1580_v35  ;;  %v2655_v50 = vld [vmem:[#allocation4_spill] sm:$0xff] }
  0x6b   : > { %1284 = vmatmul.msk.f32.gmra.mxu1 %vm962_vm1, %v936_v51  ;;  %v755_v47 = vadd.f32 %v723_v54, %v654_v38  ;;  %v342_v52 = vadd.f32 %v310_v0, %v277_v60  ;;  %v476_v44 = vmul.f32 %v1430_v7, %v1596_v58  ;;  %v764_v23 = vmul.f32 %v1445_v14, %v1908_v17 }
  0x6c   : > { %v913_v55 = vadd.f32 %v1632_v48, %v877_v46  ;;  %v565_v2 = vadd.f32 %v533_v22, %v500_v45  ;;  %v541_v28 = vmul.f32 %v1432_v8, %v1897_v25  ;;  %v286_v54 = vmul.f32 %v1419_v4, %v2621_v49  ;;  %v2656_v22 = vld [vmem:[#allocation19_spill] sm:$0xff] }
  0x6d   : > { %v820_v32 = vadd.f32 %v788_v41, %v755_v47  ;;  %v407_v16 = vadd.f32 %v375_v24, %v342_v52  ;;  %v319_v35 = vmul.f32 %v1421_v5, %v1905_v19  ;;  %v606_v60 = vmul.f32 %v1434_v9, %v2655_v50  ;;  %v2131_v24 = vld [vmem:[%s1428_s6 + $0x188] sm:$0xff] }
  0x6e   : > { %v945_v42 = vmax.f32 %v913_v55, 0.0  ;;  %v630_v58 = vadd.f32 %v598_v15, %v565_v2  ;;  %v384_v51 = vmul.f32 %v1423_v6, %v2656_v22  ;;  %v485_v41 = vmul.f32 %v1430_v7, %v2624_v36  ;;  %v2657_v46 = vld [vmem:[#allocation15_spill] sm:$0xff]  ;;  %v2658_v15 = vld [vmem:[#allocation13_spill] sm:$0xff]  ;;  %v2659_v2 = vld [vmem:[#allocation20_spill] sm:$0xff] }
  0x6f   : > { %v885_v38 = vadd.f32 %v853_v37, %v820_v32  ;;  %v508_v0 = vadd.f32 %v476_v44, %v407_v16  ;;  %v351_v20 = vadd.f32 %v319_v35, %v286_v54  ;;  %v829_v45 = vmul.f32 %v1461_v21, %v2657_v46  ;;  %v2660_v32 = vld [vmem:[#allocation14_spill] sm:$0xff]  ;;  %v2662_v22 = vld [vmem:[#allocation5_spill] sm:$0xff]  ;;  %v2664_v46 = vld [vmem:[#allocation24_spill] sm:$0xff] }
  0x70   : > { %1293 = vmatmul.msk.f32.gmra.mxu2 %vm962_vm1, %v945_v42  ;;  %v731_v49 = vadd.f32 %v699_v27, %v630_v58  ;;  %v707_v10 = vmul.f32 %v1443_v13, %v1635_v61  ;;  %v772_v47 = vmul.f32 %v1445_v14, %v2658_v15  ;;  %v550_v36 = vmul.f32 %v1432_v8, %v1934_v34  ;;  %v2661_v58 = vld [vmem:[#allocation21_spill] sm:$0xff] }
  0x71   : > { %v921_v37 = vadd.f32 %v1632_v48, %v885_v38  ;;  %v573_v52 = vadd.f32 %v541_v28, %v508_v0  ;;  %v416_v44 = vadd.f32 %v384_v51, %v351_v20  ;;  %v294_v27 = vmul.f32 %v1419_v4, %v2659_v2  ;;  %v2663_v38 = vld [vmem:[#allocation25_spill] sm:$0xff] }
  0x72   : > { %v796_v55 = vadd.f32 %v764_v23, %v731_v49  ;;  %v327_v16 = vmul.f32 %v1421_v5, %v2660_v32  ;;  %v392_v61 = vmul.f32 %v1423_v6, %v2131_v24  ;;  %v615_v28 = vmul.f32 %v1434_v9, %v2661_v58 }
  0x73   : > { %v953_v54 = vmax.f32 %v921_v37, 0.0  ;;  %v638_v35 = vadd.f32 %v606_v60, %v573_v52  ;;  %v517_v42 = vadd.f32 %v485_v41, %v416_v44  ;;  %v837_v23 = vmul.f32 %v1461_v21, %v2662_v22  ;;  %v2665_v60 = vld [vmem:[#allocation16_spill] sm:$0xff]  ;;  %v2669_v22 = vld [vmem:[#allocation27_spill] sm:$0xff] }
  0x74   : > { %v861_v50 = vadd.f32 %v829_v45, %v796_v55  ;;  %v359_v51 = vadd.f32 %v327_v16, %v294_v27  ;;  %v493_v0 = vmul.f32 %v1430_v7, %v2663_v38  ;;  %v716_v37 = vmul.f32 %v1443_v13, %v2664_v46  ;;  %v2161_v52 = vld [vmem:[%s1428_s6 + $0x189] sm:$0xff]  ;;  %v2666_v55 = vld [vmem:[#allocation18_spill] sm:$0xff] }
  0x75   : > { %1301 = vmatmul.msk.f32.gmra.mxu3 %vm962_vm1, %v953_v54  ;;  %v739_v20 = vadd.f32 %v707_v10, %v638_v35  ;;  %v582_v49 = vadd.f32 %v550_v36, %v517_v42  ;;  %v781_v41 = vmul.f32 %v1445_v14, %v2665_v60  ;;  %v558_v2 = vmul.f32 %v1432_v8, %v2666_v55  ;;  %v2667_v27 = vld [vmem:[#allocation28_spill] sm:$0xff]  ;;  %v2668_v35 = vld [vmem:[#allocation31_spill] sm:$0xff] }
  0x76   : > { %v897_v45 = vadd.f32 %v1632_v48, %v861_v50  ;;  %v424_v44 = vadd.f32 %v392_v61, %v359_v51  ;;  %v270_v16 = vmul.f32 %v1419_v4, %v2667_v27  ;;  %v303_v54 = vmul.f32 %v1421_v5, %v1963_v11  ;;  %v2177_v60 = vld [vmem:[%s1428_s6 + $0x18a] sm:$0xff] }
  0x77   : > { %v804_v10 = vadd.f32 %v772_v47, %v739_v20  ;;  %v647_v36 = vadd.f32 %v615_v28, %v582_v49  ;;  %v368_v42 = vmul.f32 %v1423_v6, %v2668_v35  ;;  %v846_v38 = vmul.f32 %v1461_v21, %v2669_v22  ;;  %2670 = vst [vmem:[#allocation33_spill] sm:$0xff] %v2177_v60  ;;  %v2671_v49 = vld [vmem:[#allocation30_spill] sm:$0xff]  ;;  %v2672_v27 = vld [vmem:[#allocation23_spill] sm:$0xff]  ;;  %v2674_v35 = vld [vmem:[#allocation12_spill] sm:$0xff] }
  0x78   : > { %v929_v58 = vmax.f32 %v897_v45, 0.0  ;;  %v525_v50 = vadd.f32 %v493_v0, %v424_v44  ;;  %v623_v61 = vmul.f32 %v1434_v9, %v2161_v52  ;;  %v335_v47 = vadd.f32 %v303_v54, %v270_v16 }
  0x79   : > { %v869_v51 = vadd.f32 %v837_v23, %v804_v10  ;;  %v748_v46 = vadd.f32 %v716_v37, %v647_v36  ;;  %v469_v28 = vmul.f32 %v1430_v7, %v1755_v30  ;;  %v724_v45 = vmul.f32 %v1443_v13, %v2671_v49  ;;  %v2673_v36 = vld [vmem:[#allocation26_spill] sm:$0xff] }
  0x7a   : > { %1277 = vmatmul.msk.f32.gmra.mxu0 %vm962_vm1, %v929_v58  ;;  %v590_v20 = vadd.f32 %v558_v2, %v525_v50  ;;  %v789_v0 = vmul.f32 %v1445_v14, %v2672_v27  ;;  %v534_v44 = vmul.f32 %v1432_v8, %v2000_v40  ;;  %v400_v10 = vadd.f32 %v368_v42, %v335_v47  ;;  %v2677_v47 = vld [vmem:[#allocation38_spill] sm:$0xff] }
  0x7b   : > { %v905_v23 = vadd.f32 %v1632_v48, %v869_v51  ;;  %v813_v37 = vadd.f32 %v781_v41, %v748_v46  ;;  %v278_v16 = vmul.f32 %v1419_v4, %v2637_v26  ;;  %v854_v2 = vmul.f32 %v1461_v21, %v2177_v60  ;;  %v2675_v51 = vld [vmem:[#allocation35_spill] sm:$0xff]  ;;  %v2676_v46 = vld [vmem:[#allocation36_spill] sm:$0xff]  ;;  %v2678_v60 = vld [vmem:[#allocation29_spill] sm:$0xff] }
  0x7c   : > { %v655_v30 = vadd.f32 %v623_v61, %v590_v20  ;;  %v311_v54 = vmul.f32 %v1421_v5, %v2673_v36  ;;  %v376_v58 = vmul.f32 %v1423_v6, %v2674_v35  ;;  %v501_v49 = vadd.f32 %v469_v28, %v400_v10 }
  0x7d   : > { %v937_v22 = vmax.f32 %v905_v23, 0.0  ;;  %v878_v50 = vadd.f32 %v846_v38, %v813_v37  ;;  %v599_v41 = vmul.f32 %v1434_v9, %v2675_v51  ;;  %v700_v26 = vmul.f32 %v1443_v13, %v2676_v46  ;;  %v2679_v46 = vld [vmem:[#allocation17_spill] sm:$0xff] }
  0x7e   : > { %v756_v42 = vadd.f32 %v724_v45, %v655_v30  ;;  %v343_v61 = vadd.f32 %v311_v54, %v278_v16  ;;  %v477_v20 = vmul.f32 %v1430_v7, %v2677_v47  ;;  %v566_v23 = vadd.f32 %v534_v44, %v501_v49  ;;  %v1322_v16 = vld [vmem:[%s1428_s6 + $0x120] sm:$0xff] }
  0x7f   : > { %1285 = vmatmul.msk.f32.gmra.mxu1 %vm962_vm1, %v937_v22  ;;  %v914_v35 = vadd.f32 %v1632_v48, %v878_v50  ;;  %v765_v38 = vmul.f32 %v1445_v14, %v2678_v60  ;;  %v542_v28 = vmul.f32 %v1432_v8, %v2023_v12  ;;  %v287_v10 = vmul.f32 %v1419_v4, %v1785_v33  ;;  %v1323_v50 = vld [vmem:[%s1428_s6 + $0x138] sm:$0xff] }
  0x80   : > { %v821_v45 = vadd.f32 %v789_v0, %v756_v42  ;;  %v408_v37 = vadd.f32 %v376_v58, %v343_v61  ;;  %v320_v30 = vmul.f32 %v1322_v16, %v1421_v5  ;;  %v631_v22 = vadd.f32 %v599_v41, %v566_v23  ;;  %v262_v58 = vld [vmem:[%s1428_s6 + $0x198] sm:$0xff]  ;;  %v2680_v42 = vld [vmem:[#allocation39_spill] sm:$0xff] }
  0x81   : > { %v946_v54 = vmax.f32 %v914_v35, 0.0  ;;  %v607_v44 = vmul.f32 %v1434_v9, %v2679_v46  ;;  %v385_v49 = vmul.f32 %v1323_v50, %v1423_v6  ;;  %v486_v0 = vmul.f32 %v1430_v7, %v2646_v59 }
  0x82   : > { %v886_v47 = vadd.f32 %v854_v2, %v821_v45  ;;  %v509_v60 = vadd.f32 %v477_v20, %v408_v37  ;;  %v352_v12 = vadd.f32 %v320_v30, %v287_v10  ;;  %v732_v33 = vadd.f32 %v700_v26, %v631_v22  ;;  %v1324_v45 = vld [vmem:[%s1428_s6 + $0x121] sm:$0xff]  ;;  %v1325_v22 = vld [vmem:[%s1428_s6 + $0x139] sm:$0xff] }
  0x83   : > { %1294 = vmatmul.msk.f32.gmra.mxu2 %vm962_vm1, %v946_v54  ;;  %v830_v41 = vmul.f32 %v1461_v21, %v2680_v42  ;;  %v708_v61 = vmul.f32 %v1443_v13, %v1821_v39  ;;  %v773_v35 = vmul.f32 %v1445_v14, %v2037_v31  ;;  %v551_v59 = vmul.f32 %v1324_v45, %v1432_v8 }
  0x84   : > { %v922_v2 = vadd.f32 %v1632_v48, %v886_v47  ;;  %v574_v20 = vadd.f32 %v542_v28, %v509_v60  ;;  %v417_v23 = vadd.f32 %v385_v49, %v352_v12  ;;  %v797_v37 = vadd.f32 %v765_v38, %v732_v33  ;;  %v2681_v28 = vld [vmem:[#allocation22_spill] sm:$0xff] }
  0x85   : > { %v295_v26 = vmul.f32 %v1419_v4, %v1817_v18  ;;  %v328_v10 = vmul.f32 %v1421_v5, %v2048_v56  ;;  %v393_v39 = vmul.f32 %v1423_v6, %v262_v58  ;;  %v616_v12 = vmul.f32 %v1325_v22, %v1434_v9  ;;  %v1326_v49 = vld [vmem:[%s1428_s6 + $0x122] sm:$0xff] }
  0x86   : > { %v954_v16 = vmax.f32 %v922_v2, 0.0  ;;  %v639_v30 = vadd.f32 %v607_v44, %v574_v20  ;;  %v518_v54 = vadd.f32 %v486_v0, %v417_v23  ;;  %v862_v60 = vadd.f32 %v830_v41, %v797_v37  ;;  %v461_v0 = vld [vmem:[%s1428_s6 + $0x199] sm:$0xff]  ;;  %v1330_v22 = vld [vmem:[%s1428_s6 + $0x61] sm:$0xff] }
  0x87   : > { %v838_v38 = vmul.f32 %v1461_v21, %v2681_v28  ;;  %v360_v46 = vadd.f32 %v328_v10, %v295_v26  ;;  %v494_v18 = vmul.f32 %v1430_v7, %v2648_v43  ;;  %v717_v44 = vmul.f32 %v1443_v13, %v1833_v63  ;;  %v1327_v2 = vld [vmem:[%s1428_s6 + $0x60] sm:$0xff]  ;;  %v1328_v63 = vld [vmem:[%s1428_s6 + $0x78] sm:$0xff] }
  0x88   : > { %1302 = vmatmul.msk.f32.gmra.mxu3 %vm962_vm1, %v954_v16  ;;  %v740_v56 = vadd.f32 %v708_v61, %v639_v30  ;;  %v583_v50 = vadd.f32 %v551_v59, %v518_v54  ;;  %v782_v47 = vmul.f32 %v1326_v49, %v1445_v14  ;;  %v898_v58 = vadd.f32 %v1632_v48, %v862_v60  ;;  %v1329_v59 = vld [vmem:[%s1428_s6 + $0x13a] sm:$0xff] }
  0x89   : > { %v425_v33 = vadd.f32 %v393_v39, %v360_v46  ;;  %v559_v43 = vmul.f32 %v1432_v8, %v2072_v53  ;;  %v271_v42 = vmul.f32 %v1419_v4, %v2650_v57  ;;  %v304_v20 = vmul.f32 %v1327_v2, %v1421_v5  ;;  %v692_v39 = vld [vmem:[%s1428_s6 + $0x19a] sm:$0xff] }
  0x8a   : > { %v805_v41 = vadd.f32 %v773_v35, %v740_v56  ;;  %v648_v61 = vadd.f32 %v616_v12, %v583_v50  ;;  %v369_v23 = vmul.f32 %v1328_v63, %v1423_v6  ;;  %v930_v45 = vmax.f32 %v898_v58, 0.0  ;;  %v2272_v60 = vld [vmem:[%s2503_s2] ss:$0 sm:$0xff]  ;;  %v1333_v50 = vld [vmem:[%s1428_s6 + $0xd8] sm:$0xff] }
  0x8b   : > { %v847_v48 = vmul.f32 %v1329_v59, %v1461_v21  ;;  %v526_v37 = vadd.f32 %v494_v18, %v425_v33  ;;  %v624_v26 = vmul.f32 %v1434_v9, %v461_v0  ;;  %v336_v57 = vadd.f32 %v304_v20, %v271_v42  ;;  %v1334_v33 = vld [vmem:[%s1428_s6 + $0x79] sm:$0xff]  ;;  %v1335_v20 = vld [vmem:[%s1428_s6 + $0x62] sm:$0xff] }
  0x8c   : > { %v870_v53 = vadd.f32 %v838_v38, %v805_v41  ;;  %v749_v10 = vadd.f32 %v717_v44, %v648_v61  ;;  %v470_v35 = vmul.f32 %v1430_v7, %v1882_v29  ;;  %1278 = vmatmul.msk.f32.gmra.mxu0 %vm962_vm1, %v930_v45  ;;  %v725_v30 = vmul.f32 %v1443_v13, %v1864_v1 }
  0x8d   : > { %v591_v16 = vadd.f32 %v559_v43, %v526_v37  ;;  %v790_v54 = vmul.f32 %v1445_v14, %v2092_v62  ;;  %v535_v12 = vmul.f32 %v1330_v22, %v1432_v8  ;;  %v401_v38 = vadd.f32 %v369_v23, %v336_v57  ;;  %v1332_v62 = vld [vmem:[%s1428_s6 + $0xc0] sm:$0xff] }
  0x8e   : > { %v906_v29 = vadd.f32 %v2272_v60, %v870_v53  ;;  %v814_v28 = vadd.f32 %v782_v47, %v749_v10  ;;  %v279_v46 = vmul.f32 %v1419_v4, %v1877_v3  ;;  %v855_v18 = vmul.f32 %v1461_v21, %v692_v39  ;;  %v1336_v23 = vld [vmem:[%s1428_s6 + $0xc1] sm:$0xff]  ;;  %v1338_v10 = vld [vmem:[%s1428_s6 + $0xd9] sm:$0xff] }
  0x8f   : > { %v656_v1 = vadd.f32 %v624_v26, %v591_v16  ;;  %v312_v56 = vmul.f32 %v1332_v62, %v1421_v5  ;;  %v377_v44 = vmul.f32 %v1333_v50, %v1423_v6  ;;  %v502_v58 = vadd.f32 %v470_v35, %v401_v38  ;;  %v1339_v57 = vld [vmem:[%s1428_s6 + $0x140] sm:$0xff] }
  0x90   : > { %v938_v49 = vmax.f32 %v906_v29, 0.0  ;;  %v879_v0 = vadd.f32 %v847_v48, %v814_v28  ;;  %v600_v47 = vmul.f32 %v1334_v33, %v1434_v9  ;;  %v701_v3 = vmul.f32 %v1443_v13, %v1908_v17  ;;  %v263_v22 = vld [vmem:[%s1428_s6 + $0x1a0] sm:$0xff] }
  0x91   : > { %v757_v43 = vadd.f32 %v725_v30, %v656_v1  ;;  %v344_v42 = vadd.f32 %v312_v56, %v279_v46  ;;  %v478_v41 = vmul.f32 %v1430_v7, %v1897_v25  ;;  %v567_v2 = vadd.f32 %v535_v12, %v502_v58  ;;  %v1337_v25 = vld [vmem:[%s1428_s6 + $0x128] sm:$0xff]  ;;  %v1340_v29 = vld [vmem:[%s1428_s6 + $0x7a] sm:$0xff] }
  0x92   : > { %1286 = vmatmul.msk.f32.gmra.mxu1 %vm962_vm1, %v938_v49  ;;  %v915_v61 = vadd.f32 %v2272_v60, %v879_v0  ;;  %v766_v63 = vmul.f32 %v1335_v20, %v1445_v14  ;;  %v543_v45 = vmul.f32 %v1336_v23, %v1432_v8  ;;  %v288_v48 = vmul.f32 %v1419_v4, %v1905_v19  ;;  %v1341_v46 = vld [vmem:[%s1428_s6 + $0xc2] sm:$0xff] }
  0x93   : > { %v822_v59 = vadd.f32 %v790_v54, %v757_v43  ;;  %v409_v17 = vadd.f32 %v377_v44, %v344_v42  ;;  %v321_v37 = vmul.f32 %v1337_v25, %v1421_v5  ;;  %v632_v53 = vadd.f32 %v600_v47, %v567_v2  ;;  %v1343_v43 = vld [vmem:[%s1428_s6 + $0x141] sm:$0xff] }
  0x94   : > { %v947_v26 = vmax.f32 %v915_v61, 0.0  ;;  %v608_v39 = vmul.f32 %v1338_v10, %v1434_v9  ;;  %v386_v35 = vmul.f32 %v1339_v57, %v1423_v6  ;;  %v487_v19 = vmul.f32 %v1430_v7, %v1934_v34  ;;  %v1342_v34 = vld [vmem:[%s1428_s6 + $0x129] sm:$0xff]  ;;  %v1347_v57 = vld [vmem:[%s1428_s6 + $0x80] sm:$0xff] }
  0x95   : > { %v887_v16 = vadd.f32 %v855_v18, %v822_v59  ;;  %v510_v30 = vadd.f32 %v478_v41, %v409_v17  ;;  %v353_v54 = vadd.f32 %v321_v37, %v288_v48  ;;  %v733_v12 = vadd.f32 %v701_v3, %v632_v53  ;;  %v1344_v41 = vld [vmem:[%s1428_s6 + $0xda] sm:$0xff]  ;;  %v1346_v10 = vld [vmem:[%s1428_s6 + $0x68] sm:$0xff] }
  0x96   : > { %1295 = vmatmul.msk.f32.gmra.mxu2 %vm962_vm1, %v947_v26  ;;  %v831_v28 = vmul.f32 %v1340_v29, %v1461_v21  ;;  %v709_v38 = vmul.f32 %v1443_v13, %v2658_v15  ;;  %v774_v1 = vmul.f32 %v1341_v46, %v1445_v14  ;;  %v552_v50 = vmul.f32 %v1342_v34, %v1432_v8  ;;  %v462_v17 = vld [vmem:[%s1428_s6 + $0x1a1] sm:$0xff] }
  0x97   : > { %v923_v18 = vadd.f32 %v2272_v60, %v887_v16  ;;  %v575_v62 = vadd.f32 %v543_v45, %v510_v30  ;;  %v418_v56 = vadd.f32 %v386_v35, %v353_v54  ;;  %v798_v44 = vadd.f32 %v766_v63, %v733_v12  ;;  %v2682_v63 = vld [vmem:[#allocation16_spill] sm:$0xff]  ;;  %v1348_v30 = vld [vmem:[%s1428_s6 + $0x142] sm:$0xff] }
  0x98   : > { %v296_v49 = vmul.f32 %v1419_v4, %v2660_v32  ;;  %v329_v0 = vmul.f32 %v1421_v5, %v2131_v24  ;;  %v394_v15 = vmul.f32 %v1423_v6, %v263_v22  ;;  %v617_v3 = vmul.f32 %v1343_v43, %v1434_v9  ;;  %v1345_v45 = vld [vmem:[%s1428_s6 + $0x12a] sm:$0xff] }
  0x99   : > { %v955_v58 = vmax.f32 %v923_v18, 0.0  ;;  %v640_v33 = vadd.f32 %v608_v39, %v575_v62  ;;  %v519_v47 = vadd.f32 %v487_v19, %v418_v56  ;;  %v863_v42 = vadd.f32 %v831_v28, %v798_v44  ;;  %v693_v62 = vld [vmem:[%s1428_s6 + $0x1a2] sm:$0xff] }
  0x9a   : > { %v839_v61 = vmul.f32 %v1344_v41, %v1461_v21  ;;  %v361_v2 = vadd.f32 %v329_v0, %v296_v49  ;;  %v495_v32 = vmul.f32 %v1430_v7, %v2666_v55  ;;  %v718_v23 = vmul.f32 %v1443_v13, %v2682_v63  ;;  %v1349_v49 = vld [vmem:[%s1428_s6 + $0xc8] sm:$0xff] }
  0x9b   : > { %1303 = vmatmul.msk.f32.gmra.mxu3 %vm962_vm1, %v955_v58  ;;  %v741_v24 = vadd.f32 %v709_v38, %v640_v33  ;;  %v584_v20 = vadd.f32 %v552_v50, %v519_v47  ;;  %v783_v59 = vmul.f32 %v1345_v45, %v1445_v14  ;;  %v899_v48 = vadd.f32 %v2272_v60, %v863_v42  ;;  %v1351_v47 = vld [vmem:[%s1428_s6 + $0x81] sm:$0xff]  ;;  %v2684_v42 = vld [vmem:[#allocation32_spill] sm:$0xff] }
  0x9c   : > { %v426_v25 = vadd.f32 %v394_v15, %v361_v2  ;;  %v560_v37 = vmul.f32 %v1432_v8, %v2161_v52  ;;  %v272_v55 = vmul.f32 %v1419_v4, %v1963_v11  ;;  %v305_v39 = vmul.f32 %v1346_v10, %v1421_v5 }
  0x9d   : > { %v806_v26 = vadd.f32 %v774_v1, %v741_v24  ;;  %v649_v53 = vadd.f32 %v617_v3, %v584_v20  ;;  %v370_v35 = vmul.f32 %v1347_v57, %v1423_v6  ;;  %v931_v16 = vmax.f32 %v899_v48, 0.0  ;;  %v1352_v20 = vld [vmem:[%s1428_s6 + $0xc9] sm:$0xff] }
  0x9e   : > { %v848_v54 = vmul.f32 %v1348_v30, %v1461_v21  ;;  %v527_v19 = vadd.f32 %v495_v32, %v426_v25  ;;  %v625_v22 = vmul.f32 %v1434_v9, %v462_v17  ;;  %v337_v11 = vadd.f32 %v305_v39, %v272_v55  ;;  %v1354_v25 = vld [vmem:[%s1428_s6 + $0xe1] sm:$0xff]  ;;  %v1356_v30 = vld [vmem:[%s1428_s6 + $0xca] sm:$0xff] }
  0x9f   : > { %v871_v52 = vadd.f32 %v839_v61, %v806_v26  ;;  %v750_v12 = vadd.f32 %v718_v23, %v649_v53  ;;  %v471_v29 = vmul.f32 %v1430_v7, %v2000_v40  ;;  %1279 = vmatmul.msk.f32.gmra.mxu0 %vm962_vm1, %v931_v16  ;;  %v726_v38 = vmul.f32 %v1443_v13, %v2672_v27  ;;  %v2683_v40 = vld [vmem:[#allocation33_spill] sm:$0xff]  ;;  %v1350_v27 = vld [vmem:[%s1428_s6 + $0xe0] sm:$0xff] }
  0xa0   : > { %v592_v28 = vadd.f32 %v560_v37, %v527_v19  ;;  %v536_v46 = vmul.f32 %v1432_v8, %v2675_v51  ;;  %v402_v56 = vadd.f32 %v370_v35, %v337_v11  ;;  %v280_v34 = vmul.f32 %v1419_v4, %v2673_v36  ;;  %v2685_v61 = vld [vmem:[#allocation29_spill] sm:$0xff]  ;;  %v1355_v26 = vld [vmem:[%s1428_s6 + $0x82] sm:$0xff] }
  0xa1   : > { %v907_v1 = vadd.f32 %v2272_v60, %v871_v52  ;;  %v815_v18 = vadd.f32 %v783_v59, %v750_v12  ;;  %v791_v44 = vmul.f32 %v1445_v14, %v2683_v40  ;;  %v313_v0 = vmul.f32 %v1349_v49, %v1421_v5  ;;  %v1353_v59 = vld [vmem:[%s1428_s6 + $0x6a] sm:$0xff] }
  0xa2   : > { %v657_v50 = vadd.f32 %v625_v22, %v592_v28  ;;  %v378_v15 = vmul.f32 %v1350_v27, %v1423_v6  ;;  %v503_v33 = vadd.f32 %v471_v29, %v402_v56  ;;  %v601_v43 = vmul.f32 %v1351_v47, %v1434_v9 }
  0xa3   : > { %v939_v51 = vmax.f32 %v907_v1, 0.0  ;;  %v880_v58 = vadd.f32 %v848_v54, %v815_v18  ;;  %v856_v4 = vmul.f32 %v1461_v21, %v693_v62  ;;  %v345_v36 = vadd.f32 %v313_v0, %v280_v34 }
  0xa4   : > { %v758_v3 = vadd.f32 %v726_v38, %v657_v50  ;;  %v479_v41 = vmul.f32 %v1430_v7, %v2684_v42  ;;  %v568_v6 = vadd.f32 %v536_v46, %v503_v33  ;;  %v702_v2 = vmul.f32 %v1443_v13, %v2685_v61 }
  0xa5   : > { %1287 = vmatmul.msk.f32.gmra.mxu1 %vm962_vm1, %v939_v51  ;;  %v916_v5 = vadd.f32 %v2272_v60, %v880_v58  ;;  %v410_v24 = vadd.f32 %v378_v15, %v345_v36  ;;  %v544_v63 = vmul.f32 %v1352_v20, %v1432_v8  ;;  %v767_v7 = vmul.f32 %v1353_v59, %v1445_v14  ;;  %v2383_v8 = vld [vmem:[%s2505_s4] ss:$0 sm:$0xff] }
  0xa6   : > { %v823_v32 = vadd.f32 %v791_v44, %v758_v3  ;;  %v633_v45 = vadd.f32 %v601_v43, %v568_v6  ;;  %v609_v37 = vmul.f32 %v1354_v25, %v1434_v9  ;;  %v832_v53 = vmul.f32 %v1355_v26, %v1461_v21 }
  0xa7   : > { %v948_v23 = vmax.f32 %v916_v5, 0.0  ;;  %v511_v48 = vadd.f32 %v479_v41, %v410_v24  ;;  %v710_v57 = vmul.f32 %v1443_v13, %v2037_v31  ;;  %v775_v54 = vmul.f32 %v1356_v30, %v1445_v14  ;;  %v1357_v31 = vld [vmem:[%s1428_s6 + $0xe2] sm:$0xff] }
  0xa8   : > { %v888_v17 = vadd.f32 %v856_v4, %v823_v32  ;;  %v734_v55 = vadd.f32 %v702_v2, %v633_v45  ;;  %v840_v11 = vmul.f32 %v1357_v31, %v1461_v21 }
  0xa9   : > { %1296 = vmatmul.msk.f32.gmra.mxu2 %vm962_vm1, %v948_v23  ;;  %v576_v39 = vadd.f32 %v544_v63, %v511_v48 }
  0xaa   : > { %v924_v10 = vadd.f32 %v2272_v60, %v888_v17  ;;  %v799_v9 = vadd.f32 %v767_v7, %v734_v55 }
  0xab   : > { %v641_v16 = vadd.f32 %v609_v37, %v576_v39  ;;  %v1080_v19 = vpop.f32.mrf.mxu0  ;;  %v1128_v22 = vpop.f32.mrf.mxu2 }
  0xac   : > { %v956_v35 = vmax.f32 %v924_v10, 0.0  ;;  %v864_v52 = vadd.f32 %v832_v53, %v799_v9  ;;  %v1081_v12 = vadd.f32 %v2383_v8, %v1080_v19  ;;  %v1129_v13 = vadd.f32 %v2383_v8, %v1128_v22 }
  0xad   : > { %v742_v14 = vadd.f32 %v710_v57, %v641_v16 }
  0xae   : > { %1304 = vmatmul.msk.f32.gmra.mxu3 %vm962_vm1, %v956_v35  ;;  %v900_v29 = vadd.f32 %v2272_v60, %v864_v52  ;;  %1177 = vst.msk [vmem:[%s2393_s16] sm:$0xff] %vm1176_vm2, %v1081_v12  ;;  %v1104_v28 = vpop.f32.mrf.mxu1  ;;  %v1152_v38 = vpop.f32.mrf.mxu3 }
  0xaf   : > { %v807_v46 = vadd.f32 %v775_v54, %v742_v14  ;;  %v1105_v1 = vadd.f32 %v2383_v8, %v1104_v28  ;;  %1193 = vst.msk [vmem:[%s2393_s16 + $0x80] sm:$0xff] %vm1176_vm2, %v1129_v13  ;;  %v1153_v18 = vadd.f32 %v2383_v8, %v1152_v38 }
  0xb0   : > { %v932_v62 = vmax.f32 %v900_v29, 0.0 }
  0xb1   : > { %v872_v56 = vadd.f32 %v840_v11, %v807_v46  ;;  %1185 = vst.msk [vmem:[%s2393_s16 + $0x40] sm:$0xff] %vm1176_vm2, %v1105_v1 }
  0xb2   : > { %1280 = vmatmul.msk.f32.gmra.mxu0 %vm962_vm1, %v932_v62  ;;  %1201 = vst.msk [vmem:[%s2393_s16 + $0xc0] sm:$0xff] %vm1176_vm2, %v1153_v18 }
  0xb3   : > { %v908_v21 = vadd.f32 %v2272_v60, %v872_v56 }
  0xb5   : > { %v940_v34 = vmax.f32 %v908_v21, 0.0 }
  0xb7   : > { %1288 = vmatmul.msk.f32.gmra.mxu1 %vm962_vm1, %v940_v34 }
  0xb9   : > { %v1131_v50 = vpop.f32.mrf.mxu2 }
  0xba   : > { %v1132_v40 = vadd.f32 %v2383_v8, %v1131_v50 }
  0xbc   : > { %1194 = vst.msk [vmem:[%s2393_s16 + $0x88] sm:$0xff] %vm1176_vm2, %v1132_v40 }
  0xbe   : > { %v1155_v49 = vpop.f32.mrf.mxu3 }
  0xbf   : > { %v1083_v44 = vpop.f32.mrf.mxu0  ;;  %v1156_v27 = vadd.f32 %v2383_v8, %v1155_v49 }
  0xc0   : > { %v1084_v0 = vadd.f32 %v2383_v8, %v1083_v44 }
  0xc1   : > { %1202 = vst.msk [vmem:[%s2393_s16 + $0xc8] sm:$0xff] %vm1176_vm2, %v1156_v27 }
  0xc2   : > { %1178 = vst.msk [vmem:[%s2393_s16 + $0x8] sm:$0xff] %vm1176_vm2, %v1084_v0 }
  0xc4   : > { %v1107_v60 = vpop.f32.mrf.mxu1 }
  0xc5   : > { %v1108_v15 = vadd.f32 %v2383_v8, %v1107_v60 }
  0xc7   : > { %1186 = vst.msk [vmem:[%s2393_s16 + $0x48] sm:$0xff] %vm1176_vm2, %v1108_v15 }
  0xcc   : > { %v1134_v51 = vpop.f32.mrf.mxu2 }
  0xcd   : > { %v1135_v58 = vadd.f32 %v2383_v8, %v1134_v51 }
  0xcf   : > { %1195 = vst.msk [vmem:[%s2393_s16 + $0x90] sm:$0xff] %vm1176_vm2, %v1135_v58 }
  0xd1   : > { %v1086_v33 = vpop.f32.mrf.mxu0 }
  0xd2   : > { %v1087_v47 = vadd.f32 %v2383_v8, %v1086_v33  ;;  %v1158_v43 = vpop.f32.mrf.mxu3 }
  0xd3   : > { %v1159_v3 = vadd.f32 %v2383_v8, %v1158_v43 }
  0xd4   : > { %1179 = vst.msk [vmem:[%s2393_s16 + $0x10] sm:$0xff] %vm1176_vm2, %v1087_v47 }
  0xd5   : > { %v1110_v4 = vpop.f32.mrf.mxu1  ;;  %1203 = vst.msk [vmem:[%s2393_s16 + $0xd0] sm:$0xff] %vm1176_vm2, %v1159_v3 }
  0xd6   : > { %v1111_v36 = vadd.f32 %v2383_v8, %v1110_v4 }
  0xd8   : > { %1187 = vst.msk [vmem:[%s2393_s16 + $0x50] sm:$0xff] %vm1176_vm2, %v1111_v36 }
  0xe1   : > { %v1137_v42 = vpop.f32.mrf.mxu2 }
  0xe2   : > { %v1138_v41 = vadd.f32 %v2383_v8, %v1137_v42 }
  0xe4   : > { %v1089_v5 = vpop.f32.mrf.mxu0  ;;  %1196 = vst.msk [vmem:[%s2393_s16 + $0x98] sm:$0xff] %vm1176_vm2, %v1138_v41 }
  0xe5   : > { %v1090_v6 = vadd.f32 %v2383_v8, %v1089_v5  ;;  %v1161_v61 = vpop.f32.mrf.mxu3 }
  0xe6   : > { %v1162_v2 = vadd.f32 %v2383_v8, %v1161_v61 }
  0xe7   : > { %1180 = vst.msk [vmem:[%s2393_s16 + $0x18] sm:$0xff] %vm1176_vm2, %v1090_v6 }
  0xe8   : > { %v1113_v32 = vpop.f32.mrf.mxu1  ;;  %1204 = vst.msk [vmem:[%s2393_s16 + $0xd8] sm:$0xff] %vm1176_vm2, %v1162_v2 }
  0xe9   : > { %v1114_v24 = vadd.f32 %v2383_v8, %v1113_v32 }
  0xeb   : > { %1188 = vst.msk [vmem:[%s2393_s16 + $0x58] sm:$0xff] %vm1176_vm2, %v1114_v24 }
  0xf3   : > { %v1140_v20 = vpop.f32.mrf.mxu2 }
  0xf4   : > { %v1141_v63 = vadd.f32 %v2383_v8, %v1140_v20 }
  0xf6   : > { %1197 = vst.msk [vmem:[%s2393_s16 + $0xa0] sm:$0xff] %vm1176_vm2, %v1141_v63 }
  0xf7   : > { %v1092_v23 = vpop.f32.mrf.mxu0 }
  0xf8   : > { %v1093_v45 = vadd.f32 %v2383_v8, %v1092_v23  ;;  %v1164_v59 = vpop.f32.mrf.mxu3 }
  0xf9   : > { %v1165_v7 = vadd.f32 %v2383_v8, %v1164_v59 }
  0xfa   : > { %1181 = vst.msk [vmem:[%s2393_s16 + $0x20] sm:$0xff] %vm1176_vm2, %v1093_v45 }
  0xfb   : > { %1205 = vst.msk [vmem:[%s2393_s16 + $0xe0] sm:$0xff] %vm1176_vm2, %v1165_v7 }
  0xfc   : > { %v1116_v17 = vpop.f32.mrf.mxu1 }
  0xfd   : > { %v1117_v48 = vadd.f32 %v2383_v8, %v1116_v17 }
  0xff   : > { %1189 = vst.msk [vmem:[%s2393_s16 + $0x60] sm:$0xff] %vm1176_vm2, %v1117_v48 }
 0x106   : > { %v1143_v25 = vpop.f32.mrf.mxu2 }
 0x107   : > { %v1144_v37 = vadd.f32 %v2383_v8, %v1143_v25 }
 0x109   : > { %1198 = vst.msk [vmem:[%s2393_s16 + $0xa8] sm:$0xff] %vm1176_vm2, %v1144_v37  ;;  %v1095_v55 = vpop.f32.mrf.mxu0 }
 0x10a   : > { %v1096_v26 = vadd.f32 %v2383_v8, %v1095_v55 }
 0x10b   : > { %v1167_v53 = vpop.f32.mrf.mxu3 }
 0x10c   : > { %v1168_v10 = vadd.f32 %v2383_v8, %v1167_v53  ;;  %1182 = vst.msk [vmem:[%s2393_s16 + $0x28] sm:$0xff] %vm1176_vm2, %v1096_v26 }
 0x10e   : > { %1206 = vst.msk [vmem:[%s2393_s16 + $0xe8] sm:$0xff] %vm1176_vm2, %v1168_v10 }
 0x10f   : > { %v1119_v39 = vpop.f32.mrf.mxu1 }
 0x110   : > { %v1120_v57 = vadd.f32 %v2383_v8, %v1119_v39 }
 0x112   : > { %1190 = vst.msk [vmem:[%s2393_s16 + $0x68] sm:$0xff] %vm1176_vm2, %v1120_v57 }
 0x119   : > { %v1146_v9 = vpop.f32.mrf.mxu2 }
 0x11a   : > { %v1147_v35 = vadd.f32 %v2383_v8, %v1146_v9 }
 0x11c   : > { %1199 = vst.msk [vmem:[%s2393_s16 + $0xb0] sm:$0xff] %vm1176_vm2, %v1147_v35  ;;  %v1098_v16 = vpop.f32.mrf.mxu0 }
 0x11d   : > { %v1099_v30 = vadd.f32 %v2383_v8, %v1098_v16 }
 0x11e   : > { %v1170_v54 = vpop.f32.mrf.mxu3 }
 0x11f   : > { %v1171_v19 = vadd.f32 %v2383_v8, %v1170_v54  ;;  %1183 = vst.msk [vmem:[%s2393_s16 + $0x30] sm:$0xff] %vm1176_vm2, %v1099_v30 }
 0x121   : > { %1207 = vst.msk [vmem:[%s2393_s16 + $0xf0] sm:$0xff] %vm1176_vm2, %v1171_v19 }
 0x122   : > { %v1122_v22 = vpop.f32.mrf.mxu1 }
 0x123   : > { %v1123_v52 = vadd.f32 %v2383_v8, %v1122_v22 }
 0x125   : > { %1191 = vst.msk [vmem:[%s2393_s16 + $0x70] sm:$0xff] %vm1176_vm2, %v1123_v52 }
 0x12c   : > { %v1149_v12 = vpop.f32.mrf.mxu2 }
 0x12d   : > { %v1150_v13 = vadd.f32 %v2383_v8, %v1149_v12 }
 0x12f   : > { %1200 = vst.msk [vmem:[%s2393_s16 + $0xb8] sm:$0xff] %vm1176_vm2, %v1150_v13  ;;  %v1101_v14 = vpop.f32.mrf.mxu0 }
 0x130   : > { %v1102_v31 = vadd.f32 %v2383_v8, %v1101_v14 }
 0x131   : > { %v1173_v11 = vpop.f32.mrf.mxu3 }
 0x132   : > { %v1174_v29 = vadd.f32 %v2383_v8, %v1173_v11  ;;  %1184 = vst.msk [vmem:[%s2393_s16 + $0x38] sm:$0xff] %vm1176_vm2, %v1102_v31 }
 0x134   : > { %1208 = vst.msk [vmem:[%s2393_s16 + $0xf8] sm:$0xff] %vm1176_vm2, %v1174_v29  ;;  %v1125_v28 = vpop.f32.mrf.mxu1 }
 0x135   : > { %v1126_v38 = vadd.f32 %v2383_v8, %v1125_v28 }
 0x137   : > { %1192 = vst.msk [vmem:[%s2393_s16 + $0x78] sm:$0xff] %vm1176_vm2, %v1126_v38 }
 0x138 PF: > { %s15_s18 = sadd.s32 1, %s1364_s18  }
 0x139   : > { %p12_p4 = scmp.ge.s32.totalorder %s15_s18, 4  }
 0x13b   :  { %14 = sbr.rel (!%p12_p4) target bundleno = 1 (0x1), region = 70 }

</bundles_post_ra>
